<compile_context>
chip_gen: v7x
topology: tpu7x:2x2x1
jax: 0.10.0
libtpu: 0.0.40
codegen_flags: <defaults>
</compile_context>

<pallas_src>
import functools
from itertools import combinations

import jax
import jax.numpy as jnp
from jax import lax
from jax.experimental import pallas as pl
from jax.experimental.pallas import tpu as pltpu


def _round_up(x: int, m: int) -> int:
    return (x + m - 1) // m * m


def _ntxent_kernel(rview_ref, cview_ref, rcat_ref, ccat_ref, rblk_ref,
                   cblk_ref, posf_ref, rows_ref, cols_ref, bound_ref,
                   out_ref, s_sc, pos_sc, *,
                   n_valid: int, nb: int, tile: int, use_bf16_exp: bool):
    """One (row-block, col-block) tile, row-block <= col-block, of one pair."""
    del rview_ref, cview_ref                 # only used inside the index_maps
    step = pl.program_id(1)

    rcat = rcat_ref[step]                    # block index in the concatenated (2N) rows
    ccat = ccat_ref[step]                    # block index in the concatenated (2N) cols
    rblk = rblk_ref[step]                    # block index within the view (pad masks)
    cblk = cblk_ref[step]

    @pl.when(step == 0)
    def _init():
        s_sc[...] = jnp.zeros_like(s_sc)
        pos_sc[...] = jnp.zeros_like(pos_sc)

    rows = rows_ref[...]                     # (T, Dp) bf16, pre-scaled by sqrt(1/temp)
    cols = cols_ref[...]                     # (T, Dp) bf16

    # sim[i, j] = z_i . z_j / temp on the MXU (bf16 operands, f32 accumulation).
    sim = lax.dot_general(rows, cols, (((1,), (1,)), ((), ())),
                          preferred_element_type=jnp.float32)     # (T, T)

    # Mask pad rows / pad cols (zero-padded batch) and, on diagonal blocks, the
    # self-similarity diagonal (the reference's `not_diag`).
    li = lax.broadcasted_iota(jnp.int32, (tile, tile), 0)
    lj = lax.broadcasted_iota(jnp.int32, (tile, tile), 1)
    valid = ((rblk * tile + li) < n_valid) & ((cblk * tile + lj) < n_valid)
    valid &= jnp.logical_not(jnp.logical_and(rcat == ccat, li == lj))

    # exp(sim - m) with m a precomputed global upper bound on sim: no per-step
    # running max, no rescale chain, no overflow.
    shifted = sim - bound_ref[...]                                # (T,T) - (1,1)
    if use_bf16_exp:                       # bf16 EUP path (v6e / v7x)
        p = jnp.exp(shifted.astype(jnp.bfloat16))
    else:                                  # v5e and older: f32 EUP
        p = jnp.exp(shifted).astype(jnp.bfloat16)
    p = jnp.where(valid, p, jnp.zeros_like(p))

    # Per-row sums of exp on the MXU (frees the XLU), laid out along lanes.
    ones = jnp.ones((1, tile), dtype=p.dtype)
    row_sum = lax.dot_general(ones, p, (((1,), (1,)), ((), ())),
                              preferred_element_type=jnp.float32)  # (1, T)
    s_sc[rcat] = s_sc[rcat] + row_sum

    # Symmetry: this same tile provides the (transposed) similarities of the
    # col-block rows against the row-block columns -- off-diagonal blocks only.
    @pl.when(rcat != ccat)
    def _symmetric():
        col_sum = lax.dot_general(ones, p, (((1,), (0,)), ((), ())),
                                  preferred_element_type=jnp.float32)  # (1, T)
        s_sc[ccat] = s_sc[ccat] + col_sum

    # Positive pairs live on the diagonal of the (view0 block r, view1 block r)
    # tiles; each positive similarity appears twice in the loss (rows i, i+N).
    @pl.when(posf_ref[step] == 1)
    def _positives():
        diag = jnp.where(li == lj, sim, jnp.zeros_like(sim))
        pos_sc[...] = pos_sc[...] + 2.0 * jnp.sum(diag)

    # Last triangular step of this pair: reduce the per-row log-denominators.
    # (The last step is the (2*nb-1, 2*nb-1) diagonal block, which is never a
    # positive block, so pos_sc is complete and never raced here.)
    @pl.when(step == pl.num_programs(1) - 1)
    def _finalize():
        bnd = bound_ref[...]                                       # (1, 1)
        lane = lax.broadcasted_iota(jnp.int32, (1, tile), 1)

        def body(b, tot):
            rvalid = ((b % nb) * tile + lane) < n_valid
            s_b = s_sc[b]                                          # (1, T)
            lse = bnd + jnp.log(jnp.where(rvalid, s_b, jnp.ones_like(s_b)))
            return tot + jnp.sum(jnp.where(rvalid, lse, jnp.zeros_like(lse)))

        total = lax.fori_loop(0, 2 * nb, body, jnp.zeros((), jnp.float32))
        out_ref[...] = (total - pos_sc[...]).astype(out_ref.dtype)


def nt_xent_loss(zs, lbls, temp: float, *, tile=None) -> jax.Array:
    """Pallas-backed NTXentLoss.forward (lbls only contributes its length)."""
    n = int(lbls.shape[0])
    assert len(zs) >= 2 and n >= 1 and float(temp) > 0.0
    views = [jnp.asarray(z, jnp.float32) for z in zs]
    d = int(views[0].shape[-1])
    for z in views:
        assert z.shape == (n, d)

    # Fold 1/temp into the embeddings once (f32, before the bf16 cast):
    # (a*z_i).(a*z_j) = z_i.z_j / temp  with a = sqrt(1/temp).
    scale = (1.0 / float(temp)) ** 0.5
    z_all = jnp.stack(views, axis=0) * jnp.float32(scale)           # (V, N, D)

    # Global bound m >= sim_ij for all i, j (Cauchy-Schwarz on the scaled z).
    bound = jnp.max(jnp.sum(z_all * z_all, axis=-1)).reshape(1, 1)
    bound = bound.astype(jnp.float32)

    # Pad N and D to MXU / vreg friendly sizes; pad rows/cols masked in-kernel.
    if tile is None:
        n_pad = _round_up(n, 128)
        tile = 256 if n_pad % 256 == 0 else 128
    else:
        assert tile % 128 == 0
        n_pad = _round_up(n, tile)
    d_pad = _round_up(d, 128)
    z_all = jnp.pad(z_all, ((0, 0), (0, n_pad - n), (0, d_pad - d)))
    z_all = z_all.astype(jnp.bfloat16)

    nb = n_pad // tile                     # blocks per view
    nb2 = 2 * nb                           # blocks in the concatenated (2N) rows
    # Triangular sweep (row block <= col block) of the symmetric Gram matrix;
    # row-major order, so the last step is the (nb2-1, nb2-1) diagonal block.
    tri = [(r, c) for r in range(nb2) for c in range(r, nb2)]
    n_steps = len(tri)

    pairs = list(combinations(range(len(views)), 2))
    num_pairs = len(pairs)

    rcat = jnp.asarray([r for r, _ in tri], jnp.int32)
    ccat = jnp.asarray([c for _, c in tri], jnp.int32)
    rblk = jnp.asarray([r % nb for r, _ in tri], jnp.int32)
    cblk = jnp.asarray([c % nb for _, c in tri], jnp.int32)
    posf = jnp.asarray([1 if (r < nb and c == r + nb) else 0 for r, c in tri],
                       jnp.int32)
    # Which stacked view feeds the row / col block of each (pair, step): this
    # expresses the per-pair torch.cat through the index_maps (no HBM concat).
    rview = jnp.asarray([[pairs[p][r // nb] for r, _ in tri]
                         for p in range(num_pairs)], jnp.int32)
    cview = jnp.asarray([[pairs[p][c // nb] for _, c in tri]
                         for p in range(num_pairs)], jnp.int32)

    try:
        kind = jax.devices()[0].device_kind.lower()
    except Exception:  # detection only affects perf, never correctness
        kind = ""
    use_bf16_exp = ("v6" in kind) or ("v7" in kind) or ("tpu7" in kind)

    kern = functools.partial(_ntxent_kernel, n_valid=n, nb=nb, tile=tile,
                             use_bf16_exp=use_bf16_exp)

    def rows_map(p, s, rv, cv, rc, cc, rb, cb, pf):
        return (rv[p, s], rb[s], 0)

    def cols_map(p, s, rv, cv, rc, cc, rb, cb, pf):
        return (cv[p, s], cb[s], 0)

    def bound_map(p, s, rv, cv, rc, cc, rb, cb, pf):
        return (0, 0)

    def out_map(p, s, rv, cv, rc, cc, rb, cb, pf):
        return (p, 0, 0)

    partials = pl.pallas_call(
        kern,
        out_shape=jax.ShapeDtypeStruct((num_pairs, 1, 1), jnp.float32),
        grid_spec=pltpu.PrefetchScalarGridSpec(
            num_scalar_prefetch=7,
            grid=(num_pairs, n_steps),
            in_specs=[
                pl.BlockSpec((None, tile, d_pad), rows_map),
                pl.BlockSpec((None, tile, d_pad), cols_map),
                pl.BlockSpec((1, 1), bound_map),
            ],
            out_specs=pl.BlockSpec((None, 1, 1), out_map),
            scratch_shapes=[
                pltpu.VMEM((nb2, 1, tile), jnp.float32),  # per-row sums of exp(sim-m)
                pltpu.VMEM((1, 1), jnp.float32),          # positive-pair accumulator
            ]),
        compiler_params=pltpu.CompilerParams(
            dimension_semantics=("parallel", "arbitrary")),
    )(rview, cview, rcat, ccat, rblk, cblk, posf, z_all, z_all, bound)

    return jnp.mean(partials[:, 0, 0])


def nt_xent_loss_ref(zs, lbls, temp: float) -> jax.Array:
    """Pure-JAX reference mirroring the PyTorch module."""
    n = lbls.shape[0]
    same = jnp.tile(jnp.eye(n, dtype=bool), (2, 2)) & ~jnp.eye(2 * n, dtype=bool)
    not_diag = ~jnp.eye(2 * n, dtype=bool)
    losses = []
    for z1, z2 in combinations(zs, 2):
        z = jnp.concatenate((z1, z2), axis=0).astype(jnp.float32)
        exp_sim = jnp.exp(
            jnp.dot(z, z.T, precision=lax.Precision.HIGHEST) / temp)
        loss = -jnp.log(exp_sim / jnp.sum(exp_sim * not_diag, axis=-1,
                                          keepdims=True))
        losses.append(jnp.sum(jnp.where(same, loss, 0.0)))
    return jnp.mean(jnp.stack(losses))


if __name__ == "__main__":
    key = jax.random.PRNGKey(0)
    k1, k2, k3, k4, k5 = jax.random.split(key, 5)

    def make_view(k, n, d):
        z = jax.random.normal(k, (n, d), dtype=jnp.float32)
        return z / jnp.linalg.norm(z, axis=-1, keepdims=True)   # typical SimCLR

    # 1) Standard SimCLR: 2 views, small batch / dim (pads to a single tile).
    N, D, TEMP = 12, 24, 0.5
    lbls = jnp.arange(N, dtype=jnp.int32)
    z1, z2 = make_view(k1, N, D), make_view(k2, N, D)
    out = jax.block_until_ready(nt_xent_loss((z1, z2), lbls, TEMP))
    ref = jax.block_until_ready(nt_xent_loss_ref((z1, z2), lbls, TEMP))
    assert jnp.allclose(out, ref, rtol=2e-2, atol=5e-2), (out, ref)

    # 2) Three views -> three pairs fused into a single kernel launch.
    z3 = make_view(k3, N, D)
    out = jax.block_until_ready(nt_xent_loss((z1, z2, z3), lbls, 0.2))
    ref = jax.block_until_ready(nt_xent_loss_ref((z1, z2, z3), lbls, 0.2))
    assert jnp.allclose(out, ref, rtol=2e-2, atol=5e-2), (out, ref)

    # 3) Batch that is not a tile multiple with a forced 128 tile: multi-block
    #    triangular sweep (pad masks + symmetric transposed accumulation).
    N2, D2 = 136, 48
    lbls2 = jnp.arange(N2, dtype=jnp.int32)
    w1, w2 = make_view(k4, N2, D2), make_view(k5, N2, D2)
    out = jax.block_until_ready(nt_xent_loss((w1, w2), lbls2, 0.5, tile=128))
    ref = jax.block_until_ready(nt_xent_loss_ref((w1, w2), lbls2, 0.5))
    assert jnp.allclose(out, ref, rtol=2e-2, atol=5e-2), (out, ref)

    print("KERNEL_OK")
</pallas_src>

<mosaic_0001>
module attributes {stable_mosaic.version = 11 : i64} {
  func.func @_ntxent_kernel(%arg0: i32, %arg1: i32, %arg2: memref<1x3xi32, #tpu.memory_space<smem>>, %arg3: memref<1x3xi32, #tpu.memory_space<smem>>, %arg4: memref<3xi32, #tpu.memory_space<smem>>, %arg5: memref<3xi32, #tpu.memory_space<smem>>, %arg6: memref<3xi32, #tpu.memory_space<smem>>, %arg7: memref<3xi32, #tpu.memory_space<smem>>, %arg8: memref<3xi32, #tpu.memory_space<smem>>, %arg9: memref<1x128x128xbf16, #tpu.memory_space<vmem>>, %arg10: memref<1x128x128xbf16, #tpu.memory_space<vmem>>, %arg11: memref<1x1xf32, #tpu.memory_space<vmem>>, %arg12: memref<1x1x1xf32, #tpu.memory_space<vmem>>, %arg13: memref<2x1x128xf32, #tpu.memory_space<vmem>>, %arg14: memref<1x1xf32, #tpu.memory_space<vmem>>) attributes {dimension_semantics = [#tpu.dimension_semantics<parallel>, #tpu.dimension_semantics<arbitrary>], iteration_bounds = array<i64: 1, 3>, scalar_prefetch = 7 : i64, scratch_operands = 2 : i64, tpu.core_type = #tpu.core_type<tc>, window_params = [{transform_indices = @transform_0, window_bounds = array<i64: 1, 128, 128>}, {transform_indices = @transform_1, window_bounds = array<i64: 1, 128, 128>}, {pipeline_mode = #tpu.pipeline_mode<synchronous>, transform_indices = @transform_2, window_bounds = array<i64: 1, 1>}, {transform_indices = @transform_3, window_bounds = array<i64: 1, 1, 1>}]} {
    %0 = arith.index_cast %arg1 : i32 to index
    %1 = memref.load %arg4[%0] : memref<3xi32, #tpu.memory_space<smem>>
    %2 = arith.index_cast %arg1 : i32 to index
    %3 = memref.load %arg5[%2] : memref<3xi32, #tpu.memory_space<smem>>
    %4 = arith.index_cast %arg1 : i32 to index
    %5 = memref.load %arg6[%4] : memref<3xi32, #tpu.memory_space<smem>>
    %6 = arith.index_cast %arg1 : i32 to index
    %7 = memref.load %arg7[%6] : memref<3xi32, #tpu.memory_space<smem>>
    %c0_i32 = arith.constant 0 : i32
    %8 = arith.cmpi eq, %arg1, %c0_i32 : i32
    %9 = arith.extui %8 : i1 to i32
    %c0_i32_0 = arith.constant 0 : i32
    %10 = arith.cmpi ne, %9, %c0_i32_0 : i32
    scf.if %10 {
      %cst_21 = arith.constant 0.000000e+00 : f32
      %63 = vector.broadcast %cst_21 : f32 to vector<2x1x128xf32>
      %c0_22 = arith.constant 0 : index
      %c0_23 = arith.constant 0 : index
      %c0_24 = arith.constant 0 : index
      %64 = vector.load %arg13[%c0_22, %c0_23, %c0_24] : memref<2x1x128xf32, #tpu.memory_space<vmem>>, vector<2x1x128xf32>
      tpu.vector_store %arg13[%c0_22, %c0_23, %c0_24], %63 {strides = array<i32>} : memref<2x1x128xf32, #tpu.memory_space<vmem>>, vector<2x1x128xf32>,
      %cst_25 = arith.constant 0.000000e+00 : f32
      %65 = vector.broadcast %cst_25 : f32 to vector<1x1xf32>
      %c0_26 = arith.constant 0 : index
      %c0_27 = arith.constant 0 : index
      %66 = vector.load %arg14[%c0_26, %c0_27] : memref<1x1xf32, #tpu.memory_space<vmem>>, vector<1x1xf32>
      tpu.vector_store %arg14[%c0_26, %c0_27], %65 {strides = array<i32>} : memref<1x1xf32, #tpu.memory_space<vmem>>, vector<1x1xf32>,
    } else {
    }
    %c0 = arith.constant 0 : index
    %c0_1 = arith.constant 0 : index
    %c0_2 = arith.constant 0 : index
    %11 = vector.load %arg9[%c0, %c0_1, %c0_2] : memref<1x128x128xbf16, #tpu.memory_space<vmem>>, vector<1x128x128xbf16>
    %12 = vector.shape_cast %11 : vector<1x128x128xbf16> to vector<128x128xbf16>
    %c0_3 = arith.constant 0 : index
    %c0_4 = arith.constant 0 : index
    %c0_5 = arith.constant 0 : index
    %13 = vector.load %arg10[%c0_3, %c0_4, %c0_5] : memref<1x128x128xbf16, #tpu.memory_space<vmem>>, vector<1x128x128xbf16>
    %14 = vector.shape_cast %13 : vector<1x128x128xbf16> to vector<128x128xbf16>
    %cst = arith.constant dense<0.000000e+00> : vector<128x128xf32>
    %15 = tpu.matmul %12, %14, %cst {dimension_numbers = #tpu.dot_dimension_numbers<[1], [1], [0], [0], [0, 0, 1, 0], [], []>} : vector<128x128xbf16>, vector<128x128xbf16>, vector<128x128xf32> -> vector<128x128xf32>
    %16 = tpu.iota {dimensions = array<i32: 0>} : vector<128x128xi32>
    %17 = tpu.iota {dimensions = array<i32: 1>} : vector<128x128xi32>
    %c128_i32 = arith.constant 128 : i32
    %18 = arith.muli %5, %c128_i32 : i32
    %19 = vector.broadcast %18 : i32 to vector<128x128xi32>
    %20 = arith.addi %19, %16 : vector<128x128xi32>
    %c12_i32 = arith.constant 12 : i32
    %21 = vector.broadcast %c12_i32 : i32 to vector<128x128xi32>
    %22 = arith.cmpi slt, %20, %21 : vector<128x128xi32>
    %c128_i32_6 = arith.constant 128 : i32
    %23 = arith.muli %7, %c128_i32_6 : i32
    %24 = vector.broadcast %23 : i32 to vector<128x128xi32>
    %25 = arith.addi %24, %17 : vector<128x128xi32>
    %c12_i32_7 = arith.constant 12 : i32
    %26 = vector.broadcast %c12_i32_7 : i32 to vector<128x128xi32>
    %27 = arith.cmpi slt, %25, %26 : vector<128x128xi32>
    %28 = arith.andi %22, %27 : vector<128x128xi1>
    %29 = arith.cmpi eq, %1, %3 : i32
    %30 = arith.cmpi eq, %16, %17 : vector<128x128xi32>
    %31 = vector.broadcast %29 : i1 to vector<128x128xi1>
    %32 = arith.andi %31, %30 : vector<128x128xi1>
    %cst_8 = arith.constant dense<true> : vector<128x128xi1>
    %33 = arith.xori %32, %cst_8 : vector<128x128xi1>
    %34 = arith.andi %28, %33 : vector<128x128xi1>
    %c0_9 = arith.constant 0 : index
    %c0_10 = arith.constant 0 : index
    %35 = vector.load %arg11[%c0_9, %c0_10] : memref<1x1xf32, #tpu.memory_space<vmem>>, vector<1x1xf32>
    %36 = vector.broadcast %35 : vector<1x1xf32> to vector<128x128xf32>
    %37 = arith.subf %15, %36 : vector<128x128xf32>
    %38 = math.exp %37 : vector<128x128xf32>
    %39 = arith.truncf %38 : vector<128x128xf32> to vector<128x128xbf16>
    %cst_11 = arith.constant 0.000000e+00 : bf16
    %40 = vector.broadcast %cst_11 : bf16 to vector<128x128xbf16>
    %41 = arith.select %34, %39, %40 : vector<128x128xi1>, vector<128x128xbf16>
    %cst_12 = arith.constant 1.000000e+00 : bf16
    %42 = vector.broadcast %cst_12 : bf16 to vector<1x128xbf16>
    %cst_13 = arith.constant dense<0.000000e+00> : vector<1x128xf32>
    %43 = tpu.matmul %42, %41, %cst_13 {dimension_numbers = #tpu.dot_dimension_numbers<[1], [1], [0], [0], [0, 0, 1, 0], [], []>} : vector<1x128xbf16>, vector<128x128xbf16>, vector<1x128xf32> -> vector<1x128xf32>
    %44 = arith.index_cast %1 : i32 to index
    %c0_14 = arith.constant 0 : index
    %c0_15 = arith.constant 0 : index
    %45 = vector.load %arg13[%44, %c0_14, %c0_15] : memref<2x1x128xf32, #tpu.memory_space<vmem>>, vector<1x1x128xf32>
    %46 = vector.shape_cast %45 : vector<1x1x128xf32> to vector<1x128xf32>
    %47 = arith.addf %46, %43 : vector<1x128xf32>
    %48 = arith.index_cast %1 : i32 to index
    %c0_16 = arith.constant 0 : index
    %c0_17 = arith.constant 0 : index
    %49 = vector.load %arg13[%48, %c0_16, %c0_17] : memref<2x1x128xf32, #tpu.memory_space<vmem>>, vector<1x1x128xf32>
    %50 = vector.shape_cast %49 : vector<1x1x128xf32> to vector<1x128xf32>
    %51 = vector.shape_cast %47 : vector<1x128xf32> to vector<1x1x128xf32>
    tpu.vector_store %arg13[%48, %c0_16, %c0_17], %51 {strides = array<i32>} : memref<2x1x128xf32, #tpu.memory_space<vmem>>, vector<1x1x128xf32>,
    %52 = arith.cmpi ne, %1, %3 : i32
    %53 = arith.extui %52 : i1 to i32
    %c0_i32_18 = arith.constant 0 : i32
    %54 = arith.cmpi ne, %53, %c0_i32_18 : i32
    scf.if %54 {
      %cst_21 = arith.constant dense<0.000000e+00> : vector<1x128xf32>
      %63 = tpu.matmul %42, %41, %cst_21 {dimension_numbers = #tpu.dot_dimension_numbers<[1], [0], [0], [1], [0, 0, 1, 1], [], []>} : vector<1x128xbf16>, vector<128x128xbf16>, vector<1x128xf32> -> vector<1x128xf32>
      %64 = arith.index_cast %3 : i32 to index
      %c0_22 = arith.constant 0 : index
      %c0_23 = arith.constant 0 : index
      %65 = vector.load %arg13[%64, %c0_22, %c0_23] : memref<2x1x128xf32, #tpu.memory_space<vmem>>, vector<1x1x128xf32>
      %66 = vector.shape_cast %65 : vector<1x1x128xf32> to vector<1x128xf32>
      %67 = arith.addf %66, %63 : vector<1x128xf32>
      %68 = arith.index_cast %3 : i32 to index
      %c0_24 = arith.constant 0 : index
      %c0_25 = arith.constant 0 : index
      %69 = vector.load %arg13[%68, %c0_24, %c0_25] : memref<2x1x128xf32, #tpu.memory_space<vmem>>, vector<1x1x128xf32>
      %70 = vector.shape_cast %69 : vector<1x1x128xf32> to vector<1x128xf32>
      %71 = vector.shape_cast %67 : vector<1x128xf32> to vector<1x1x128xf32>
      tpu.vector_store %arg13[%68, %c0_24, %c0_25], %71 {strides = array<i32>} : memref<2x1x128xf32, #tpu.memory_space<vmem>>, vector<1x1x128xf32>,
    } else {
    }
    %55 = arith.index_cast %arg1 : i32 to index
    %56 = memref.load %arg8[%55] : memref<3xi32, #tpu.memory_space<smem>>
    %c1_i32 = arith.constant 1 : i32
    %57 = arith.cmpi eq, %56, %c1_i32 : i32
    %58 = arith.extui %57 : i1 to i32
    %c0_i32_19 = arith.constant 0 : i32
    %59 = arith.cmpi ne, %58, %c0_i32_19 : i32
    scf.if %59 {
      %63 = arith.cmpi eq, %16, %17 : vector<128x128xi32>
      %cst_21 = arith.constant 0.000000e+00 : f32
      %64 = vector.broadcast %cst_21 : f32 to vector<128x128xf32>
      %65 = arith.select %63, %15, %64 : vector<128x128xi1>, vector<128x128xf32>
      %c0_22 = arith.constant 0 : index
      %c0_23 = arith.constant 0 : index
      %66 = vector.load %arg14[%c0_22, %c0_23] : memref<1x1xf32, #tpu.memory_space<vmem>>, vector<1x1xf32>
      %67 = vector.shape_cast %65 : vector<128x128xf32> to vector<1x128x128xf32>
      %cst_24 = arith.constant dense<0.000000e+00> : vector<1xf32>
      %68 = vector.multi_reduction <add>, %67, %cst_24 [1, 2] : vector<1x128x128xf32> to vector<1xf32>
      %69 = vector.shape_cast %68 : vector<1xf32> to vector<1x1x1xf32>
      %70 = vector.extract %69[0, 0, 0] : f32 from vector<1x1x1xf32>
      %cst_25 = arith.constant 2.000000e+00 : f32
      %71 = arith.mulf %cst_25, %70 : f32
      %72 = vector.broadcast %71 : f32 to vector<1x1xf32>
      %73 = arith.addf %66, %72 : vector<1x1xf32>
      %c0_26 = arith.constant 0 : index
      %c0_27 = arith.constant 0 : index
      %74 = vector.load %arg14[%c0_26, %c0_27] : memref<1x1xf32, #tpu.memory_space<vmem>>, vector<1x1xf32>
      tpu.vector_store %arg14[%c0_26, %c0_27], %73 {strides = array<i32>} : memref<1x1xf32, #tpu.memory_space<vmem>>, vector<1x1xf32>,
    } else {
    }
    %c2_i32 = arith.constant 2 : i32
    %60 = arith.cmpi eq, %arg1, %c2_i32 : i32
    %61 = arith.extui %60 : i1 to i32
    %c0_i32_20 = arith.constant 0 : i32
    %62 = arith.cmpi ne, %61, %c0_i32_20 : i32
    scf.if %62 {
      %c0_21 = arith.constant 0 : index
      %c0_22 = arith.constant 0 : index
      %63 = vector.load %arg11[%c0_21, %c0_22] : memref<1x1xf32, #tpu.memory_space<vmem>>, vector<1x1xf32>
      %64 = tpu.iota {dimensions = array<i32: 1>} : vector<1x128xi32>
      %cst_23 = arith.constant 0.000000e+00 : f32
      %c0_i32_24 = arith.constant 0 : i32
      %c2_i32_25 = arith.constant 2 : i32
      %65 = arith.addi %c0_i32_24, %c2_i32_25 : i32
      %c1_i32_26 = arith.constant 1 : i32
      %66 = scf.for %arg15 = %c0_i32_24 to %65 step %c1_i32_26 iter_args(%arg16 = %cst_23) -> (f32)  : i32 {
        %c1_i32_33 = arith.constant 1 : i32
        %c0_i32_34 = arith.constant 0 : i32
        %73 = arith.cmpi eq, %c1_i32_33, %c0_i32_34 : i32
        %c1_i32_35 = arith.constant 1 : i32
        %74 = arith.select %73, %c1_i32_35, %c1_i32_33 : i32
        %75 = arith.remsi %arg15, %74 : i32
        %c0_i32_36 = arith.constant 0 : i32
        %76 = arith.cmpi ne, %75, %c0_i32_36 : i32
        %c0_i32_37 = arith.constant 0 : i32
        %77 = arith.cmpi slt, %75, %c0_i32_37 : i32
        %c0_i32_38 = arith.constant 0 : i32
        %78 = arith.cmpi slt, %74, %c0_i32_38 : i32
        %79 = arith.xori %77, %78 : i1
        %80 = arith.andi %79, %76 : i1
        %81 = arith.addi %75, %74 : i32
        %82 = arith.select %80, %81, %75 : i32
        %c128_i32_39 = arith.constant 128 : i32
        %83 = arith.muli %82, %c128_i32_39 : i32
        %84 = vector.broadcast %83 : i32 to vector<1x128xi32>
        %85 = arith.addi %84, %64 : vector<1x128xi32>
        %c12_i32_40 = arith.constant 12 : i32
        %86 = vector.broadcast %c12_i32_40 : i32 to vector<1x128xi32>
        %87 = arith.cmpi slt, %85, %86 : vector<1x128xi32>
        %88 = arith.index_cast %arg15 : i32 to index
        %c0_41 = arith.constant 0 : index
        %c0_42 = arith.constant 0 : index
        %89 = vector.load %arg13[%88, %c0_41, %c0_42] : memref<2x1x128xf32, #tpu.memory_space<vmem>>, vector<1x1x128xf32>
        %90 = vector.shape_cast %89 : vector<1x1x128xf32> to vector<1x128xf32>
        %cst_43 = arith.constant 1.000000e+00 : f32
        %91 = vector.broadcast %cst_43 : f32 to vector<1x128xf32>
        %92 = arith.select %87, %90, %91 : vector<1x128xi1>, vector<1x128xf32>
        %93 = math.log %92 : vector<1x128xf32>
        %94 = vector.broadcast %63 : vector<1x1xf32> to vector<1x128xf32>
        %95 = arith.addf %94, %93 : vector<1x128xf32>
        %cst_44 = arith.constant 0.000000e+00 : f32
        %96 = vector.broadcast %cst_44 : f32 to vector<1x128xf32>
        %97 = arith.select %87, %95, %96 : vector<1x128xi1>, vector<1x128xf32>
        %98 = vector.shape_cast %97 : vector<1x128xf32> to vector<1x1x128xf32>
        %cst_45 = arith.constant dense<0.000000e+00> : vector<1xf32>
        %99 = vector.multi_reduction <add>, %98, %cst_45 [1, 2] : vector<1x1x128xf32> to vector<1xf32>
        %100 = vector.shape_cast %99 : vector<1xf32> to vector<1x1x1xf32>
        %101 = vector.extract %100[0, 0, 0] : f32 from vector<1x1x1xf32>
        %102 = arith.addf %arg16, %101 : f32
        scf.yield %102 : f32
      }
      %c2_i32_27 = arith.constant 2 : i32
      %c0_28 = arith.constant 0 : index
      %c0_29 = arith.constant 0 : index
      %67 = vector.load %arg14[%c0_28, %c0_29] : memref<1x1xf32, #tpu.memory_space<vmem>>, vector<1x1xf32>
      %68 = vector.broadcast %66 : f32 to vector<1x1xf32>
      %69 = arith.subf %68, %67 : vector<1x1xf32>
      %c0_30 = arith.constant 0 : index
      %c0_31 = arith.constant 0 : index
      %c0_32 = arith.constant 0 : index
      %70 = vector.load %arg12[%c0_30, %c0_31, %c0_32] : memref<1x1x1xf32, #tpu.memory_space<vmem>>, vector<1x1x1xf32>
      %71 = vector.shape_cast %70 : vector<1x1x1xf32> to vector<1x1xf32>
      %72 = vector.shape_cast %69 : vector<1x1xf32> to vector<1x1x1xf32>
      tpu.vector_store %arg12[%c0_30, %c0_31, %c0_32], %72 {strides = array<i32>} : memref<1x1x1xf32, #tpu.memory_space<vmem>>, vector<1x1x1xf32>,
    } else {
    }
    return
  }
  func.func @transform_0(%arg0: i32, %arg1: i32, %arg2: memref<1x3xi32, #tpu.memory_space<smem>>, %arg3: memref<1x3xi32, #tpu.memory_space<smem>>, %arg4: memref<3xi32, #tpu.memory_space<smem>>, %arg5: memref<3xi32, #tpu.memory_space<smem>>, %arg6: memref<3xi32, #tpu.memory_space<smem>>, %arg7: memref<3xi32, #tpu.memory_space<smem>>, %arg8: memref<3xi32, #tpu.memory_space<smem>>) -> (i32, i32, i32) {
    %0 = arith.index_cast %arg0 : i32 to index
    %1 = arith.index_cast %arg1 : i32 to index
    %2 = memref.load %arg2[%0, %1] : memref<1x3xi32, #tpu.memory_space<smem>>
    %3 = arith.index_cast %arg1 : i32 to index
    %4 = memref.load %arg6[%3] : memref<3xi32, #tpu.memory_space<smem>>
    %c0_i32 = arith.constant 0 : i32
    %c0_i32_0 = arith.constant 0 : i32
    return %2, %4, %c0_i32 : i32, i32, i32
  }
  func.func @transform_1(%arg0: i32, %arg1: i32, %arg2: memref<1x3xi32, #tpu.memory_space<smem>>, %arg3: memref<1x3xi32, #tpu.memory_space<smem>>, %arg4: memref<3xi32, #tpu.memory_space<smem>>, %arg5: memref<3xi32, #tpu.memory_space<smem>>, %arg6: memref<3xi32, #tpu.memory_space<smem>>, %arg7: memref<3xi32, #tpu.memory_space<smem>>, %arg8: memref<3xi32, #tpu.memory_space<smem>>) -> (i32, i32, i32) {
    %0 = arith.index_cast %arg0 : i32 to index
    %1 = arith.index_cast %arg1 : i32 to index
    %2 = memref.load %arg3[%0, %1] : memref<1x3xi32, #tpu.memory_space<smem>>
    %3 = arith.index_cast %arg1 : i32 to index
    %4 = memref.load %arg7[%3] : memref<3xi32, #tpu.memory_space<smem>>
    %c0_i32 = arith.constant 0 : i32
    %c0_i32_0 = arith.constant 0 : i32
    return %2, %4, %c0_i32 : i32, i32, i32
  }
  func.func @transform_2(%arg0: i32, %arg1: i32, %arg2: memref<1x3xi32, #tpu.memory_space<smem>>, %arg3: memref<1x3xi32, #tpu.memory_space<smem>>, %arg4: memref<3xi32, #tpu.memory_space<smem>>, %arg5: memref<3xi32, #tpu.memory_space<smem>>, %arg6: memref<3xi32, #tpu.memory_space<smem>>, %arg7: memref<3xi32, #tpu.memory_space<smem>>, %arg8: memref<3xi32, #tpu.memory_space<smem>>) -> (i32, i32) {
    %c0_i32 = arith.constant 0 : i32
    %c0_i32_0 = arith.constant 0 : i32
    %c0_i32_1 = arith.constant 0 : i32
    return %c0_i32, %c0_i32_0 : i32, i32
  }
  func.func @transform_3(%arg0: i32, %arg1: i32, %arg2: memref<1x3xi32, #tpu.memory_space<smem>>, %arg3: memref<1x3xi32, #tpu.memory_space<smem>>, %arg4: memref<3xi32, #tpu.memory_space<smem>>, %arg5: memref<3xi32, #tpu.memory_space<smem>>, %arg6: memref<3xi32, #tpu.memory_space<smem>>, %arg7: memref<3xi32, #tpu.memory_space<smem>>, %arg8: memref<3xi32, #tpu.memory_space<smem>>) -> (i32, i32, i32) {
    %c0_i32 = arith.constant 0 : i32
    %c0_i32_0 = arith.constant 0 : i32
    %c0_i32_1 = arith.constant 0 : i32
    return %arg0, %c0_i32, %c0_i32_0 : i32, i32, i32
  }
}

</mosaic_0001>

<bundles_post_ra>
// kernel: tpu_custom_call.1
= control target key start
LH: loop header
LB: loop body
LE: loop exit
PB: predicated region body
PF: predicated region fallthrough
CT: control target
= control target key end

     0   :  { %s2920_s0 = inlined_call_operand.vmem [shape: s32[1,3], index: 0, kind: input, shape index: {}]   ;;  %s2921_s7 = inlined_call_operand.hbm [shape: bf16[2,128,128], index: 7, kind: input, shape index: {}]   ;;  %s2922_s8 = inlined_call_operand.hbm [shape: bf16[2,128,128], index: 8, kind: input, shape index: {}]   ;;  %s2923_s10 = inlined_call_operand.hbm [shape: f32[1,1,1], index: 10, kind: output, shape index: {}]   ;;  %s2924_s1 = inlined_call_operand.vmem [shape: s32[1,3], index: 1, kind: input, shape index: {}]   ;;  %s2925_s9 = inlined_call_operand.<no memory space> [shape: f32[1,1], index: 9, kind: input, shape index: {}]   ;;  %s2926_s2 = inlined_call_operand.vmem [shape: s32[3], index: 2, kind: input, shape index: {}]   ;;  %s2927_s3 = inlined_call_operand.vmem [shape: s32[3], index: 3, kind: input, shape index: {}]   ;;  %s2928_s4 = inlined_call_operand.vmem [shape: s32[3], index: 4, kind: input, shape index: {}]   ;;  %s2929_s5 = inlined_call_operand.vmem [shape: s32[3], index: 5, kind: input, shape index: {}]   ;;  %s2930_s6 = inlined_call_operand.vmem [shape: s32[3], index: 6, kind: input, shape index: {}]  }
   0x1   :  { %2957 = sst [smem:[#allocation33_spill]] %s2923_s10  ;;  %s15_s15 = sshll.u32 %s2920_s0, 4  ;;  %v43_v0 = vstv %s2925_s9  ;;  %s16_s15 = int_to_ptr.vmem [resolvable:$true] %s15_s15 }
   0x2   :  { %s19_s18 = sshll.u32 %s2924_s1, 4  ;;  %44 = vst [vmem:[#allocation12] sm:$0x1] %v43_v0  ;;  %s1467_s21 = scalar_lea.vmem %s16_s15, 16  ;;  %s20_s18 = int_to_ptr.vmem [resolvable:$true] %s19_s18 }
   0x3   :  { %p1468_p0 = scmp.ne.s32.totalorder %s16_s15, %s1467_s21  ;;  %p1472_p1 = scmp.lt.s32.totalorder %s16_s15, %s16_s15 }
   0x4   :  { %p1473_p2 = scmp.lt.s32.totalorder %s1467_s21, %s1467_s21 }
   0x6   :  { %p1474_p3 = por %p1473_p2, %p1472_p1 }
   0x8   :  { %p1475_p4 = pnand %p1474_p3, %p1468_p0 }
   0xa   :  { %1478 = shalt.err (!%p1475_p4)  }
   0xb   :  { %s1739_s22 = smov [#allocation5]   ;;  %s1479_s0 = scalar_lea.vmem %s20_s18, 16 }
   0xc   :  { %18 = dma.vmem_to_smem %s16_s15, 16, %s1739_s22, [#allocation4] }
   0xd   :  { %p1480_p5 = scmp.ne.s32.totalorder %s20_s18, %s1479_s0  ;;  %p1484_p6 = scmp.lt.s32.totalorder %s20_s18, %s20_s18 }
   0xe   :  { %p1485_p7 = scmp.lt.s32.totalorder %s1479_s0, %s1479_s0 }
  0x10   :  { %p1486_p8 = por %p1485_p7, %p1484_p6 }
  0x12   :  { %p1487_p9 = pnand %p1486_p8, %p1480_p5 }
  0x14   :  { %1490 = shalt.err (!%p1487_p9)  }
  0x15   :  { %s1740_s1 = smov [#allocation6]   ;;  %s23_s24 = sshll.u32 %s2926_s2, 4  ;;  %s24_s24 = int_to_ptr.vmem [resolvable:$true] %s23_s24 }
  0x16   :  { %22 = dma.vmem_to_smem %s20_s18, 16, %s1740_s1, [#allocation4] }
  0x17   :  { %s27_s27 = sshll.u32 %s2927_s3, 4  ;;  %s1491_s28 = scalar_lea.vmem %s24_s24, 16  ;;  %s28_s27 = int_to_ptr.vmem [resolvable:$true] %s27_s27 }
  0x18   :  { %p1492_p10 = scmp.ne.s32.totalorder %s24_s24, %s1491_s28  ;;  %p1496_p11 = scmp.lt.s32.totalorder %s24_s24, %s24_s24 }
  0x19   :  { %p1497_p12 = scmp.lt.s32.totalorder %s1491_s28, %s1491_s28 }
  0x1b   :  { %p1498_p13 = por %p1497_p12, %p1496_p11 }
  0x1d   :  { %p1499_p0 = pnand %p1498_p13, %p1492_p10 }
  0x1f   :  { %1502 = shalt.err (!%p1499_p0)  }
  0x20   :  { %s1741_s29 = smov [#allocation7]   ;;  %s1503_s30 = scalar_lea.vmem %s28_s27, 16 }
  0x21   :  { %26 = dma.vmem_to_smem %s24_s24, 16, %s1741_s29, [#allocation4] }
  0x22   :  { %p1504_p1 = scmp.ne.s32.totalorder %s28_s27, %s1503_s30  ;;  %p1508_p2 = scmp.lt.s32.totalorder %s28_s27, %s28_s27 }
  0x23   :  { %p1509_p3 = scmp.lt.s32.totalorder %s1503_s30, %s1503_s30 }
  0x25   :  { %p1510_p4 = por %p1509_p3, %p1508_p2 }
  0x27   :  { %p1511_p5 = pnand %p1510_p4, %p1504_p1 }
  0x29   :  { %1514 = shalt.err (!%p1511_p5)  }
  0x2a   :  { %s1742_s2 = smov [#allocation8]   ;;  %s31_s12 = sshll.u32 %s2928_s4, 4  ;;  %s32_s12 = int_to_ptr.vmem [resolvable:$true] %s31_s12 }
  0x2b   :  { %30 = dma.vmem_to_smem %s28_s27, 16, %s1742_s2, [#allocation4] }
  0x2c   :  { %s35_s15 = sshll.u32 %s2929_s5, 4  ;;  %s1515_s16 = scalar_lea.vmem %s32_s12, 16  ;;  %s36_s15 = int_to_ptr.vmem [resolvable:$true] %s35_s15 }
  0x2d   :  { %p1516_p6 = scmp.ne.s32.totalorder %s32_s12, %s1515_s16  ;;  %p1520_p7 = scmp.lt.s32.totalorder %s32_s12, %s32_s12 }
  0x2e   :  { %p1521_p8 = scmp.lt.s32.totalorder %s1515_s16, %s1515_s16 }
  0x30   :  { %p1522_p9 = por %p1521_p8, %p1520_p7 }
  0x32   :  { %p1523_p10 = pnand %p1522_p9, %p1516_p6 }
  0x34   :  { %1526 = shalt.err (!%p1523_p10)  }
  0x35   :  { %s1743_s17 = smov [#allocation9]   ;;  %s1527_s18 = scalar_lea.vmem %s36_s15, 16 }
  0x36   :  { %34 = dma.vmem_to_smem %s32_s12, 16, %s1743_s17, [#allocation4] }
  0x37   :  { %p1528_p11 = scmp.ne.s32.totalorder %s36_s15, %s1527_s18  ;;  %p1532_p12 = scmp.lt.s32.totalorder %s36_s15, %s36_s15 }
  0x38   :  { %p1533_p13 = scmp.lt.s32.totalorder %s1527_s18, %s1527_s18 }
  0x3a   :  { %p1534_p0 = por %p1533_p13, %p1532_p12 }
  0x3c   :  { %p1535_p1 = pnand %p1534_p0, %p1528_p11 }
  0x3e   :  { %1538 = shalt.err (!%p1535_p1)  }
  0x3f   :  { %s1744_s4 = smov [#allocation10]   ;;  %s39_s20 = sshll.u32 %s2930_s6, 4  ;;  %s40_s20 = int_to_ptr.vmem [resolvable:$true] %s39_s20 }
  0x40   :  { %38 = dma.vmem_to_smem %s36_s15, 16, %s1744_s4, [#allocation4] }
  0x41   :  { %s1539_s21 = scalar_lea.vmem %s40_s20, 16  ;;  %p1544_p3 = scmp.lt.s32.totalorder %s40_s20, %s40_s20 }
  0x42   :  { %p1540_p2 = scmp.ne.s32.totalorder %s40_s20, %s1539_s21  ;;  %p1545_p4 = scmp.lt.s32.totalorder %s1539_s21, %s1539_s21 }
  0x44   :  { %p1546_p5 = por %p1545_p4, %p1544_p3 }
  0x46   :  { %p1547_p6 = pnand %p1546_p5, %p1540_p2 }
  0x48   :  { %1550 = shalt.err (!%p1547_p6)  }
  0x49   :  { %s1745_s22 = smov [#allocation11]  }
  0x4a   :  { %42 = dma.vmem_to_smem %s40_s20, 16, %s1745_s22, [#allocation4] }
  0x4b   :  { %1681 = dma.done.wait [#allocation4], 112 }
  0x4c   :  { %1682 = vsyncadd [#allocation4], 4294967184 }
  0x4d   :  { %46 = sfence }
  0x4e   :  { %47 = vsyncpa [#allocation14], 0 }
  0x4f   :  { %49 = vsyncpa [#allocation14 + $0x1], 0 }
  0x50   :  { %50 = vsyncpa [#allocation17], 0 }
  0x51   :  { %52 = vsyncpa [#allocation17 + $0x1], 0 }
  0x52   :  { %53 = vsyncpa [#allocation15], 0  ;;  %s1840_s0 = smov 0   ;;  %s1842_s6 = smov 0  }
  0x53   :  { %s1844_s1 = smov 0   ;;  %s1846_s9 = smov 0  }
  0x54   :  { %s1848_s23 = smov 0   ;;  %s1850_s24 = smov 0  }
  0x55   :  { %s1852_s25 = smov 0   ;;  %s1854_s26 = smov 0  }
  0x56   :  { %s1856_s27 = smov 0  }
  0x57 LB: > { %2958 = sst [smem:[#allocation31_spill]] %s1721_s25  ;;  %s2931_s28 = sadd.s32 4294967295, %s1729_s27   ;;  %s1729_s27 = sphi %s1856_s27, %s59_s27   ;;  %s1725_s26 = sphi %s1854_s26, %s3082_s26   ;;  %s1721_s25 = sphi %s1852_s25, %s3081_s25   ;;  %s1717_s24 = sphi %s1850_s24, %s3080_s24   ;;  %s1713_s23 = sphi %s1848_s23, %s3079_s23   ;;  %s1709_s9 = sphi %s1846_s9, %s3078_s9   ;;  %s1705_s1 = sphi %s1844_s1, %s3077_s1   ;;  %s1701_s6 = sphi %s1842_s6, %s3076_s6   ;;  %s1697_s0 = sphi %s1840_s0, %s3075_s0  }
  0x58   : > { %s68_s29 = sadd.s32 1, %s1725_s26  ;;  %s75_s30 = sshra.s32 %s1725_s26, 7 }
  0x59   : > { %p69_p7 = scmp.ge.s32.totalorder %s68_s29, 3  ;;  %s1117_s2 = sshll.u32 %s75_s30, 7 }
  0x5a   : > { %s80_s3 = sand.u32 127, %s1725_s26  ;;  %s83_s12 = sld [smem:[#allocation9 + %s1725_s26]] }
  0x5b   : > { %s3084_s29 = smov (%p69_p7, %s68_s29), 0  ;;  %s1889_s11 = sadd.s32 %s1117_s2, %s80_s3 }
  0x5c   : > { %s82_s13 = sld [smem:[#allocation5 + %s1889_s11]]  ;;  %s84_s14 = sshra.s32 %s3084_s29, 7 }
  0x5d   : > { %s1118_s15 = sshll.u32 %s84_s14, 7  ;;  %s89_s16 = sand.u32 127, %s3084_s29 }
  0x5e   : > { %s1895_s17 = sadd.s32 %s1118_s15, %s89_s16  ;;  %s92_s18 = sld [smem:[#allocation9 + %s3084_s29]] }
  0x5f   : > { %s91_s4 = sld [smem:[#allocation5 + %s1895_s17]]  ;;  %s98_s5 = sadd.s32 1, %s1717_s24 }
  0x60   : > { %p105_p8 = scmp.ne.s32.totalorder %s1717_s24, %s1713_s23  ;;  %p2936_p9 = scmp.eq.s32.totalorder %s1729_s27, 0 }
  0x61   : > { %p111_p10 = scmp.ne.s32.totalorder %s1713_s23, %s1709_s9  ;;  %p1906_p11 = scmp.eq.s32.totalorder %s2931_s28, 0 }
  0x62   : > { %p1912_p12 = por %p2936_p9, %p105_p8  ;;  %s1917_s21 = sld [smem:[#allocation6 + %s1889_s11]] }
  0x63   : > { %p1921_p13 = por %p1906_p11, %p111_p10  ;;  %p2935_p0 = scmp.lt.s32.totalorder %s1729_s27, 3 }
  0x64   : > { %s94_s9 = ssub.s32 %s83_s12, %s92_s18  ;;  %s2932_s2 = sand.u32 1, %s1717_s24  }
  0x65   : > { %s2961_s22 = scalar_select %p1921_p13, 1, 0 }
  0x66   : > { %s93_s30 = ssub.s32 %s82_s13, %s91_s4  ;;  %s1123_s14 = sshll.u32 %s2932_s2, 6 }
  0x67   : > { %s95_s3 = sor.u32 %s94_s9, %s93_s30  ;;  %p1933_p2 = pnand %p2935_p0, %p1912_p12 }
  0x68   : > { %p96_p1 = scmp.eq.s32.totalorder %s95_s3, 0  ;;  %s235_s9 = scalar_lea.vmem [#allocation13], %s1123_s14 }
  0x69   : > { %s1273_s12 = scalar_select %p1912_p12, [#allocation5], [#allocation19] }
  0x6a   : > { %s1938_s16 = scalar_select %p96_p1, %s1717_s24, %s98_s5  }
  0x6b   : > { %s1274_s13 = scalar_select %p1912_p12, %s1889_s11, 0 }
  0x6c   : > { %2963 = sst [smem:[#allocation32_spill]] %s1938_s16  ;;  %s3086_s12 = smov (!%p2935_p0, %s1273_s12), [#allocation23] }
  0x6d   : > { %s3088_s13 = smov (!%p2935_p0, %s1274_s13), 0  ;;  %s253_s30 = sshll.u32 %s235_s9, 4  ;;  %s1958_s30 = int_to_ptr.vmem [resolvable:$true] %s253_s30 }
  0x6e   : > { %s1275_s18 = scalar_select %p1912_p12, [#allocation9], [#allocation20] }
  0x6f   : > { %s243_s4 = sld [smem:[%s3086_s12 + %s3088_s13]]  ;;  %p1133_p3 = scmp.ge.s32.totalorder %s1729_s27, 1 }
  0x70   : > { %s1276_s5 = scalar_select %p1912_p12, %s1725_s26, 0 }
  0x71   : > { %s3090_s18 = smov (!%p2935_p0, %s1275_s18), [#allocation24]  ;;  %p293_p4 = scmp.lt.s32.totalorder %s1729_s27, 4 }
  0x72   : > { %s3092_s5 = smov (!%p2935_p0, %s1276_s5), 0  ;;  %s1967_s13 = sld [smem:[#allocation10 + %s1725_s26]] }
  0x73   : > { %s244_s3 = sld [smem:[%s3090_s18 + %s3092_s5]]  ;;  %p1962_p5 = pnand %p1133_p3, %p293_p4 }
  0x74   : > { %s1970_s2 = sld [smem:[#allocation6 + %s1895_s17]]  ;;  %p1553_p7 = pneg %p1933_p2 }
  0x75   : > { %s1126_s28 = sshll.u32 %s243_s4, 4  ;;  %s1978_s18 = sld [smem:[#allocation10 + %s3084_s29]] }
  0x76   : > { %s2964_s12 = scalar_select %p1962_p5, 1, 0 }
  0x77   : > { %s2965_s4 = sand.u32 1, %s1717_s24   ;;  %s1556_s16 = scalar_lea.hbm %s2921_s7, 2048 }
  0x78   : > { %s1982_s5 = scalar_lea.sflag [#allocation14], %s2965_s4 }
  0x79   : > { %s1125_s20 = sshll.u32 %s244_s3, 4 }
  0x7a   : > { %s250_s14 = sadd.s32 %s1126_s28, %s1125_s20 }
  0x7b   : > { %s1127_s9 = sshll.u32 %s250_s14, 6 }
  0x7c   : > { %s1975_s25 = scalar_lea.hbm %s2921_s7, %s1127_s9 }
  0x7d   : > { %s1551_s28 = scalar_lea.hbm %s1975_s25, 1024  ;;  %p1557_p12 = scmp.lt.u32.totalorder %s1975_s25, %s2921_s7 }
  0x7e   : > { %p1552_p6 = scmp.ne.s32.totalorder %s1975_s25, %s1551_s28  ;;  %p1558_p1 = scmp.lt.u32.totalorder %s1556_s16, %s1551_s28 }
  0x7f   : > { %p1560_p4 = scmp.lt.u32.totalorder %s1551_s28, %s1975_s25 }
  0x80   : > { %p1554_p8 = pnand %p1553_p7, %p1552_p6  ;;  %p1559_p3 = por %p1558_p1, %p1557_p12 }
  0x82   : > { %p1555_p10 = pneg %p1554_p8  ;;  %p1561_p0 = por %p1560_p4, %p1559_p3 }
  0x84   : > { %p1562_p9 = pnand %p1561_p0, %p1555_p10 }
  0x86   : > { %1565 = shalt.err (!%p1562_p9)
}
  0x87   : > { %s1566_s14 = scalar_lea.vmem %s1958_s30, 1024  ;;  %s1746_s9 = smov [#allocation13]  }
  0x88   : > { %p1567_p6 = scmp.ne.s32.totalorder %s1958_s30, %s1566_s14  ;;  %s1571_s4 = sshll.u32 %s1746_s9, 4  ;;  %s1572_s4 = int_to_ptr.vmem [resolvable:$false] %s1571_s4 }
  0x89   : > { %s1573_s10 = scalar_lea.vmem %s1572_s4, 2048  ;;  %p1574_p5 = scmp.lt.s32.totalorder %s1958_s30, %s1572_s4 }
  0x8a   : > { %p1569_p8 = pnand %p1567_p6, %p1553_p7  ;;  %p1575_p12 = scmp.lt.s32.totalorder %s1573_s10, %s1566_s14 }
  0x8c   : > { %p1570_p13 = pneg %p1569_p8  ;;  %p1576_p1 = por %p1575_p12, %p1574_p5 }
  0x8e   : > { %p1577_p3 = pnand %p1576_p1, %p1570_p13 }
  0x90   : > { %1580 = shalt.err (!%p1577_p3)
}
  0x91   : > { %s2938_s28 = smov 64   ;;  %s1748_s17 = smov 4  }
  0x92   : > { %1296 = dma.hbm_to_vmem [thread:$0]  (!%p1933_p2), %s1975_s25, 1024, %s1958_s30, %s1982_s5, %s2938_s28, %s2938_s28, %s1748_s17  }
  0x93   : > { %p151_p9 = scmp.ne.s32.totalorder %s1705_s1, %s1701_s6  ;;  %p157_p13 = scmp.ne.s32.totalorder %s1701_s6, %s1697_s0 }
  0x94   : > { %p2966_p0 = scmp.eq.s32.totalorder %s1729_s27, 0  ;;  %s139_s3 = ssub.s32 %s1917_s21, %s1970_s2 }
  0x95   : > { %p2027_p7 = por %p157_p13, %p1906_p11  ;;  %s140_s25 = ssub.s32 %s1967_s13, %s1978_s18 }
  0x96   : > { %p2019_p5 = por %p151_p9, %p2966_p0  ;;  %s141_s0 = sor.u32 %s140_s25, %s139_s3 }
  0x97   : > { %s144_s30 = sadd.s32 1, %s1705_s1  ;;  %p142_p2 = scmp.eq.s32.totalorder %s141_s0, 0 }
  0x98   : > { %s263_s5 = sand.u32 1, %s1705_s1   ;;  %s3094_s11 = smov (!%p2019_p5, %s1889_s11), 0 }
  0x99   : > { %s1278_s20 = scalar_select %p2019_p5, [#allocation6], [#allocation21] }
  0x9a   : > { %s2038_s14 = scalar_select %p142_p2, %s1705_s1, %s144_s30  }
  0x9b   : > { %p2969_p10 = scmp.lt.s32.totalorder %s1729_s27, 3  ;;  %s1128_s21 = sshll.u32 %s263_s5, 6 }
  0x9c   : > { %s1280_s19 = scalar_select %p2019_p5, [#allocation10], [#allocation22] }
  0x9d   : > { %s3096_s20 = smov (!%p2969_p10, %s1278_s20), [#allocation25]  ;;  %p2970_p11 = pmov %p2969_p10 }
  0x9e   : > { %s1281_s13 = scalar_select %p2019_p5, %s1725_s26, 0 }
  0x9f   : > { %s3098_s11 = smov (!%p2970_p11, %s3094_s11), 0  ;;  %p2971_p4 = pmov %p2969_p10 }
  0xa0   : > { %s275_s2 = sld [smem:[%s3096_s20 + %s3098_s11]]  ;;  %s267_s10 = scalar_lea.vmem [#allocation16], %s1128_s21 }
  0xa1   : > { %s3100_s19 = smov (!%p2971_p4, %s1280_s19), [#allocation26]  ;;  %p2972_p6 = pmov %p2971_p4 }
  0xa2   : > { %p2973_p8 = pmov %p2971_p4  ;;  %s285_s3 = sshll.u32 %s267_s10, 4  ;;  %s2064_s3 = int_to_ptr.vmem [resolvable:$true] %s285_s3 }
  0xa3   : > { %s3102_s13 = smov (!%p2972_p6, %s1281_s13), 0  ;;  %s2071_s28 = scalar_lea.sflag [#allocation17], %s263_s5 }
  0xa4   : > { %p2060_p12 = pnand %p2973_p8, %p2019_p5  ;;  %s276_s9 = sld [smem:[%s3100_s19 + %s3102_s13]] }
  0xa5   : > { %s1586_s13 = scalar_lea.hbm %s2922_s8, 2048 }
  0xa6   : > { %s1131_s4 = sshll.u32 %s275_s2, 4  ;;  %p1583_p3 = pneg %p2060_p12 }
  0xaa   : > { %s1130_s25 = sshll.u32 %s276_s9, 4 }
  0xab   : > { %s282_s11 = sadd.s32 %s1131_s4, %s1130_s25 }
  0xac   : > { %s1132_s0 = sshll.u32 %s282_s11, 6 }
  0xad   : > { %s2069_s16 = scalar_lea.hbm %s2922_s8, %s1132_s0 }
  0xae   : > { %s1581_s19 = scalar_lea.hbm %s2069_s16, 1024  ;;  %p1587_p0 = scmp.lt.u32.totalorder %s2069_s16, %s2922_s8 }
  0xaf   : > { %p1582_p1 = scmp.ne.s32.totalorder %s2069_s16, %s1581_s19  ;;  %p1588_p5 = scmp.lt.u32.totalorder %s1586_s13, %s1581_s19 }
  0xb0   : > { %p1590_p10 = scmp.lt.u32.totalorder %s1581_s19, %s2069_s16 }
  0xb1   : > { %p1584_p9 = pnand %p1583_p3, %p1582_p1  ;;  %p1589_p2 = por %p1588_p5, %p1587_p0 }
  0xb3   : > { %p1585_p13 = pneg %p1584_p9  ;;  %p1591_p11 = por %p1590_p10, %p1589_p2 }
  0xb5   : > { %p1592_p4 = pnand %p1591_p11, %p1585_p13 }
  0xb7   : > { %1595 = shalt.err (!%p1592_p4)
}
  0xb8   : > { %s1596_s5 = scalar_lea.vmem %s2064_s3, 1024  ;;  %s1749_s10 = smov [#allocation16]  }
  0xb9   : > { %p1597_p6 = scmp.ne.s32.totalorder %s2064_s3, %s1596_s5  ;;  %s1601_s25 = sshll.u32 %s1749_s10, 4  ;;  %s1602_s25 = int_to_ptr.vmem [resolvable:$false] %s1601_s25 }
  0xba   : > { %s1603_s11 = scalar_lea.vmem %s1602_s25, 2048  ;;  %p1604_p9 = scmp.lt.s32.totalorder %s2064_s3, %s1602_s25 }
  0xbb   : > { %p1599_p8 = pnand %p1597_p6, %p1583_p3  ;;  %p1605_p0 = scmp.lt.s32.totalorder %s1603_s11, %s1596_s5 }
  0xbd   : > { %p1600_p1 = pneg %p1599_p8  ;;  %p1606_p5 = por %p1605_p0, %p1604_p9 }
  0xbf   : > { %p1607_p2 = pnand %p1606_p5, %p1600_p1 }
  0xc1   : > { %1610 = shalt.err (!%p1607_p2)
}
  0xc2   : > { %s2975_s0 = smov 64   ;;  %p2976_p3 = scmp.ne.s32.totalorder %s2964_s12, 0 }
  0xc3   : > { %1303 = dma.hbm_to_vmem [thread:$0]  (!%p2060_p12), %s2069_s16, 1024, %s2064_s3, %s2071_s28, %s2975_s0, %s2975_s0, %s1748_s17  }
  0xc4   : > { %297 = sbr.rel (%p2976_p3) target bundleno = 1456 (0x5b0), region = 32  ;;  %s299_s30 = sand.u32 (!%p2976_p3), 1, %s1713_s23  }
  0xc5   : > { %s1134_s20 = sshll.u32 (!%p2976_p3), %s299_s30, 6  ;;  %s300_s19 = scalar_lea.sflag (!%p2976_p3), [#allocation14], %s299_s30 }
  0xc6   : > { %s2105_s21 = scalar_lea.vmem (!%p2976_p3), [#allocation13], %s1134_s20  ;;  %p2977_p13 = scmp.ne.s32.totalorder (!%p2976_p3), %s2961_s22, 0 }
  0xcb   : > { %1684 = dma.done.wait (%p2977_p13), %s300_s19, 1024  }
  0xcc   : > { %1686 = vsyncadd (%p2977_p13), %s300_s19, 4294966272  ;;  %s308_s18 = sand.u32 1, %s1701_s6  }
  0xcd   : > { %s1135_s2 = sshll.u32 %s308_s18, 6  ;;  %s309_s28 = scalar_lea.sflag [#allocation17], %s308_s18 }
  0xce   : > { %s2112_s17 = scalar_lea.vmem [#allocation16], %s1135_s2 }
  0xcf   : > { %1688 = dma.done.wait (%p2027_p7), %s309_s28, 1024  }
  0xd0   : > { %1690 = vsyncadd (%p2027_p7), %s309_s28, 4294966272  ;;  %s2978_s12 = sld [smem:[#allocation31_spill]] }
  0xd6   : > { %s2119_s3 = sld [smem:[#allocation7 + %s2978_s12]]  ;;  %p1136_p12 = scmp.ne.s32.totalorder %s2978_s12, 0 }
  0xd7   : > { %s2122_s22 = sld [smem:[#allocation8 + %s2978_s12]]  ;;  %vm367_vm0 = vcmask (!%p1136_p12), 0   ;;  %v1750_v1 = vmov (!%p1136_p12), 0.0  }
  0xd8   : > { %s2125_s16 = sld [smem:[#allocation9 + %s2978_s12]]  ;;  %364 = sbr.rel (%p1136_p12) target bundleno = 223 (0xdf), region = 44  ;;  %365 = vst [vmem:[#allocation2] sm:$0x1] (!%p1136_p12), %v1750_v1  ;;  %366 = vst [vmem:[#allocation2 + $0x1] sm:$0x1] (!%p1136_p12), %v1750_v1 }
  0xd9   : > { %s2128_s13 = sld [smem:[#allocation10 + %s2978_s12]]  ;;  %368 = vst.msk [vmem:[#allocation3] sm:$0x1] (!%p1136_p12), %vm367_vm0, %v1750_v1 }
  0xdf PF: > { %v1416_v2 = vld [vmem:[%s2112_s17] sm:$0xff]   ;;  %v1417_v3 = vld [vmem:[%s2112_s17 + $0x8] sm:$0xff]   ;;  %v1751_v4 = vmov 0   ;;  %v1418_v5 = vld [vmem:[%s2112_s17 + $0x10] sm:$0xff]   ;;  %v1752_v20 = vmov 0.0   ;;  %vm1753_vm1 = vmmov 0   ;;  %v594_v21 = vlaneseq  ;;  %p667_p7 = scmp.eq.s32.totalorder %s2119_s3, %s2122_s22 }
  0xe0   : > { %1415 = vset.pattern.permute.xlu0 %v1751_v4  ;;  %1197 = vmatprep.subr.bf16.mxu0 %v1416_v2  ;;  %v1424_v6 = vld [vmem:[%s2105_s21] sm:$0xff]   ;;  %v1419_v7 = vld [vmem:[%s2112_s17 + $0x18] sm:$0xff]   ;;  %v1421_v10 = vld [vmem:[%s2112_s17 + $0x28] sm:$0xff]   ;;  %s1153_s15 = sshll.u32 %s2125_s16, 7  ;;  %s1154_s9 = sshll.u32 %s2128_s13, 7  ;;  %vm2949_vm12 = vmmov 1  }
  0xe1   : > { %1198 = vmatpush3.bf16.xpose.msra.mxu0 %v1416_v2  ;;  %1213 = vmatprep.mubr.bf16.mxu0 %v1424_v6  ;;  %v1155_v8 = vld [vmem:[#allocation12] ss:$0 sm:$0xff]  ;;  %v1420_v9 = vld [vmem:[%s2112_s17 + $0x20] sm:$0xff]   ;;  %v1422_v11 = vld [vmem:[%s2112_s17 + $0x30] sm:$0xff]   ;;  %v2151_v22 = vshrl.u32 %v594_v21, 7  ;;  %v2155_v23 = vand.u32 127, %v594_v21  ;;  %v2160_v24 = vstv %s1153_s15  ;;  %v648_v25 = vstv %s1154_s9 }
  0xe2   : > { %1199 = vmatprep.subr.bf16.mxu0 %v1417_v3  ;;  %742 = vperm.xlu0 %1415, %v1155_v8   ;;  %v1423_v12 = vld [vmem:[%s2112_s17 + $0x38] sm:$0xff]   ;;  %v1425_v13 = vld [vmem:[%s2105_s21 + $0x8] sm:$0xff]   ;;  %v1426_v14 = vld [vmem:[%s2105_s21 + $0x10] sm:$0xff]   ;;  %s684_s4 = scalar_select %p667_p7, 1, 0 }
  0xe3   : > { %v1427_v15 = vld [vmem:[%s2105_s21 + $0x18] sm:$0xff]   ;;  %v1428_v16 = vld [vmem:[%s2105_s21 + $0x20] sm:$0xff]   ;;  %v1429_v17 = vld [vmem:[%s2105_s21 + $0x28] sm:$0xff]   ;;  %1229 = vmatprep.subr.bf16.mxu1 %v1752_v20  ;;  %1245 = vmatprep.mubr.msk.bf16.mxu1 %vm1753_vm1, %v1752_v20  ;;  %v2163_v26 = vadd.s32 8, %v2151_v22  ;;  %v615_v27 = vadd.s32 %v2160_v24, %v2151_v22  ;;  %v2168_v28 = vadd.s32 %v648_v25, %v2155_v23  ;;  %vm2942_vm2 = vcmp.eq.s32.totalorder %v2151_v22, %v2155_v23  ;;  %s857_s5 = scalar_lea.vmem [#allocation2], %s2119_s3  ;;  %s905_s10 = scalar_lea.vmem (!%p667_p7), [#allocation2], %s2122_s22 }
  0xe4   : > { %v1430_v18 = vld [vmem:[%s2105_s21 + $0x30] sm:$0xff]   ;;  %v1431_v19 = vld [vmem:[%s2105_s21 + $0x38] sm:$0xff]   ;;  %v685_v29 = vstv %s684_s4  ;;  %v2180_v32 = vadd.s32 16, %v2151_v22  ;;  %v2198_v35 = vadd.s32 24, %v2151_v22  ;;  %v2248_v51 = vadd.s32 32, %v2151_v22 }
  0xe5   : > { %v616_v30 = vadd.s32 %v2160_v24, %v2163_v26  ;;  %vm2174_vm3 = vcmp.eq.s32.totalorder %v685_v29, 1  ;;  %vm631_vm4 = vcmp.lt.s32.totalorder %v615_v27, 12  ;;  %vm2953_vm5 = vcmp.lt.s32.totalorder %v2168_v28, 12  ;;  %v858_v31 = vld [vmem:[%s857_s5] sm:$0x1] }
  0xe6   : > { %vm2939_vm6 = vcmp.eq.s32.totalorder %v2163_v26, %v2155_v23  ;;  %vm687_vm8 = vmand %vm2174_vm3, %vm2942_vm2  ;;  %v617_v36 = vadd.s32 %v2160_v24, %v2180_v32  ;;  %v618_v45 = vadd.s32 %v2160_v24, %v2198_v35  ;;  %vm2940_vm1 = vcmp.eq.s32.totalorder %v2180_v32, %v2155_v23 }
  0xe7   : > { %vm632_vm7 = vcmp.lt.s32.totalorder %v616_v30, 12  ;;  %vm2193_vm9 = vmand %vm631_vm4, %vm2953_vm5  ;;  %v2268_v55 = vadd.s32 40, %v2151_v22  ;;  %v619_v57 = vadd.s32 %v2160_v24, %v2248_v51  ;;  %v2431_v54 = vadd.s32 64, %v2151_v22 }
  0xe8   : > { %vm688_vm10 = vmand %vm2174_vm3, %vm2939_vm6  ;;  %vm633_vm15 = vcmp.lt.s32.totalorder %v617_v36, 12 }
  0xe9   : > { %1200 = vmatpush3.bf16.xpose.msra.mxu0 %v1417_v3  ;;  %vm2211_vm11 = vmand %vm632_vm7, %vm2953_vm5  ;;  %vm2941_vm7 = vcmp.eq.s32.totalorder %v2198_v35, %v2155_v23  ;;  %v620_v4 = vadd.s32 %v2160_v24, %v2268_v55 }
  0xea   : > { %1201 = vmatprep.subr.bf16.mxu0 %v1418_v5  ;;  %vm2220_vm13 = vmxor %vm687_vm8, %vm2949_vm12  ;;  %vm634_vm8 = vcmp.lt.s32.totalorder %v618_v45, 12 }
  0xeb   : > { %vm2229_vm14 = vmxor %vm688_vm10, %vm2949_vm12 }
  0xec   : > { %vm719_vm0 = vmand %vm2193_vm9, %vm2220_vm13  ;;  %vm2943_vm9 = vcmp.eq.s32.totalorder %v2248_v51, %v2155_v23  ;;  %vm2944_vm13 = vcmp.eq.s32.totalorder %v2268_v55, %v2155_v23 }
  0xed   : > { %vm720_vm4 = vmand %vm2211_vm11, %vm2229_vm14  ;;  %vm636_vm14 = vcmp.lt.s32.totalorder %v620_v4, 12  ;;  %v2467_v4 = vadd.s32 72, %v2151_v22 }
  0xee   : > { %vm2258_vm10 = vmand %vm633_vm15, %vm2953_vm5 }
  0xef   : > { %vm689_vm6 = vmand %vm2174_vm3, %vm2940_vm1 }
  0xf0   : > { %vm690_vm15 = vmand %vm2174_vm3, %vm2941_vm7 }
  0xf1   : > { %1202 = vmatpush3.bf16.xpose.msra.mxu0 %v1418_v5  ;;  %vm2285_vm1 = vmand %vm634_vm8, %vm2953_vm5 }
  0xf2   : > { %1203 = vmatprep.subr.bf16.mxu0 %v1419_v7  ;;  %vm2294_vm7 = vmxor %vm689_vm6, %vm2949_vm12 }
  0xf3   : > { %vm2303_vm8 = vmxor %vm690_vm15, %vm2949_vm12  ;;  %vm635_vm15 = vcmp.lt.s32.totalorder %v619_v57, 12 }
  0xf4   : > { %vm2321_vm6 = vmpackc.low %vm720_vm4, %vm719_vm0 }
  0xf5   : > { %vm721_vm2 = vmand %vm2258_vm10, %vm2294_vm7 }
  0xf6   : > { %vm722_vm11 = vmand %vm2285_vm1, %vm2303_vm8 }
  0xf7   : > { %vm2344_vm0 = vmand %vm635_vm15, %vm2953_vm5 }
  0xf8   : > { %vm2355_vm4 = vmand %vm2174_vm3, %vm2943_vm9 }
  0xf9   : > { %1204 = vmatpush3.bf16.xpose.msra.mxu0 %v1419_v7  ;;  %vm692_vm15 = vmand %vm2174_vm3, %vm2944_vm13 }
  0xfa   : > { %1205 = vmatprep.subr.bf16.mxu0 %v1420_v9  ;;  %vm2381_vm9 = vmand %vm636_vm14, %vm2953_vm5 }
  0xfb   : > { %vm2392_vm13 = vmxor %vm2355_vm4, %vm2949_vm12 }
  0xfc   : > { %vm2399_vm14 = vmxor %vm692_vm15, %vm2949_vm12 }
  0xfd   : > { %vm2419_vm4 = vmpackc.low %vm722_vm11, %vm721_vm2 }
  0xfe   : > { %vm724_vm2 = vmand %vm2381_vm9, %vm2399_vm14  ;;  %vm2948_vm14 = vcmp.eq.s32.totalorder %v2467_v4, %v2155_v23 }
 0x101   : > { %1206 = vmatpush3.bf16.xpose.msra.mxu0 %v1420_v9  ;;  %v2332_v9 = vadd.s32 48, %v2151_v22 }
 0x102   : > { %1207 = vmatprep.subr.bf16.mxu0 %v1421_v10 }
 0x103   : > { %v621_v21 = vadd.s32 %v2160_v24, %v2332_v9  ;;  %vm2945_vm7 = vcmp.eq.s32.totalorder %v2332_v9, %v2155_v23 }
 0x104   : > { %vm2462_vm11 = vmand %vm2174_vm3, %vm2945_vm7 }
 0x105   : > { %vm637_vm15 = vcmp.lt.s32.totalorder %v621_v21, 12 }
 0x106   : > { %vm2447_vm8 = vmand %vm637_vm15, %vm2953_vm5 }
 0x109   : > { %1208 = vmatpush3.bf16.xpose.msra.mxu0 %v1421_v10 }
 0x10a   : > { %1209 = vmatprep.subr.bf16.mxu0 %v1422_v11 }
 0x111   : > { %1210 = vmatpush3.bf16.xpose.msra.mxu0 %v1422_v11 }
 0x112   : > { %1211 = vmatprep.subr.bf16.mxu0 %v1423_v12 }
 0x119   : > { %1212 = vmatpush3.bf16.xpose.msra.mxu0 %v1423_v12  ;;  %v2538_v12 = vadd.s32 80, %v2151_v22 }
 0x120   : > { %1214 = vmatmul.mubr.bf16.vlgmr.msra.gmra.mrb[0].mxu0 %v1425_v13 }
 0x121   : > { %1217 = vmatprep.mubr.bf16.mxu0 %v1426_v14 }
 0x128   : > { %1218 = vmatmul.mubr.bf16.gmra.mrb[4].mxu0 %v1427_v15 }
 0x129   : > { %1221 = vmatprep.mubr.bf16.mxu0 %v1428_v16  ;;  %v2360_v16 = vadd.s32 56, %v2151_v22 }
 0x12b   : > { %vm2946_vm1 = vcmp.eq.s32.totalorder %v2360_v16, %v2155_v23 }
 0x12c   : > { %vm694_vm15 = vmand %vm2174_vm3, %vm2946_vm1 }
 0x12d   : > { %vm2498_vm1 = vmxor %vm2462_vm11, %vm2949_vm12 }
 0x130   : > { %1222 = vmatmul.mubr.bf16.gmra.mrb[8].mxu0 %v1429_v17 }
 0x131   : > { %1225 = vmatprep.mubr.bf16.mxu0 %v1430_v18 }
 0x138   : > { %1226 = vmatmul.mubr.bf16.gmra.mrb[12].mxu0 %v1431_v19 }
 0x161   : > { %v2189_v33 = vpop.permute.xlu0 %742 }
 0x1f3   : > { %v2207_v37 = vpop.f32.mrb[0].mxu0 }
 0x1f4   : > { %v747_v39 = vsub.f32 %v2207_v37, %v2189_v33  ;;  %v2217_v40 = vpop.f32.mrb[1].mxu0 }
 0x1f5   : > { %v745_v42 = vsub.f32 %v2217_v40, %v2189_v33  ;;  %v2226_v43 = vpop.f32.mrb[2].mxu0 }
 0x1f6   : > { %v765_v46 = vmul.f32 1.442695, %v747_v39  ;;  %v748_v47 = vsub.f32 %v2226_v43, %v2189_v33  ;;  %v2237_v48 = vpop.f32.mrb[3].mxu0 }
 0x1f7   : > { %v761_v49 = vmul.f32 1.442695, %v745_v42  ;;  %v746_v50 = vsub.f32 %v2237_v48, %v2189_v33 }
 0x1f8   : > { %1432 = vpow2.f32 %v765_v46  ;;  %v767_v52 = vmul.f32 1.442695, %v748_v47  ;;  %v622_v47 = vadd.s32 %v2160_v24, %v2360_v16 }
 0x1f9   : > { %1434 = vpow2.f32 %v761_v49  ;;  %v763_v53 = vmul.f32 1.442695, %v746_v50 }
 0x1fa   : > { %1436 = vpow2.f32 %v767_v52  ;;  %vm638_vm10 = vcmp.lt.s32.totalorder %v622_v47, 12 }
 0x1fb   : > { %1438 = vpow2.f32 %v763_v53  ;;  %v2270_v56 = vpop.f32.mrb[4].mxu0  ;;  %vm2489_vm7 = vmand %vm638_vm10, %vm2953_vm5 }
 0x1fc   : > { %v751_v58 = vsub.f32 %v2270_v56, %v2189_v33  ;;  %v2281_v59 = vpop.f32.mrb[5].mxu0  ;;  %vm2507_vm10 = vmxor %vm694_vm15, %vm2949_vm12 }
 0x1fd   : > { %v749_v61 = vsub.f32 %v2281_v59, %v2189_v33  ;;  %v2291_v62 = vpop.f32.mrb[6].mxu0 }
 0x1fe   : > { %v773_v0 = vmul.f32 1.442695, %v751_v58  ;;  %v752_v1 = vsub.f32 %v2291_v62, %v2189_v33  ;;  %v2300_v2 = vpop.f32.mrb[7].mxu0 }
 0x1ff   : > { %v769_v5 = vmul.f32 1.442695, %v749_v61  ;;  %v750_v6 = vsub.f32 %v2300_v2, %v2189_v33  ;;  %v2618_v61 = vadd.s32 96, %v2151_v22 }
 0x200   : > { %1440 = vpow2.f32 %v773_v0  ;;  %v775_v8 = vmul.f32 1.442695, %v752_v1 }
 0x201   : > { %1442 = vpow2.f32 %v769_v5  ;;  %v771_v10 = vmul.f32 1.442695, %v750_v6 }
 0x202   : > { %v2340_v11 = vpop.eup %1432  ;;  %1444 = vpow2.f32 %v775_v8 }
 0x203   : > { %v1435_v13 = vpop.eup %1434  ;;  %1446 = vpow2.f32 %v771_v10  ;;  %v2348_v14 = vpop.f32.mrb[8].mxu0  ;;  %v623_v10 = vadd.s32 %v2160_v24, %v2431_v54 }
 0x204   : > { %v1437_v17 = vpop.eup %1436  ;;  %v755_v18 = vsub.f32 %v2348_v14, %v2189_v33  ;;  %v2364_v19 = vpop.f32.mrb[9].mxu0 }
 0x205   : > { %v1439_v25 = vpop.eup %1438  ;;  %v753_v27 = vsub.f32 %v2364_v19, %v2189_v33  ;;  %v2375_v29 = vpop.f32.mrb[10].mxu0  ;;  %v794_v30 = vpack.c.bf16 %v1437_v17, %v2340_v11  ;;  %vm639_vm11 = vcmp.lt.s32.totalorder %v623_v10, 12 }
 0x206   : > { %v781_v36 = vmul.f32 1.442695, %v755_v18  ;;  %v756_v38 = vsub.f32 %v2375_v29, %v2189_v33  ;;  %v2387_v39 = vpop.f32.mrb[11].mxu0  ;;  %v793_v41 = vpack.c.bf16 %v1439_v25, %v1435_v13 }
 0x207   : > { %v777_v44 = vmul.f32 1.442695, %v753_v27  ;;  %v754_v45 = vsub.f32 %v2387_v39, %v2189_v33 }
 0x208   : > { %1448 = vpow2.f32 %v781_v36  ;;  %v783_v49 = vmul.f32 1.442695, %v756_v38  ;;  %v2407_v50 = vsel %vm2321_vm6, %v793_v41, 0  ;;  %vm723_vm6 = vmand %vm2344_vm0, %vm2392_vm13  ;;  %v2504_v38 = vsel %vm2419_vm4, %v794_v30, 0 }
 0x209   : > { %1450 = vpow2.f32 %v777_v44  ;;  %v779_v53 = vmul.f32 1.442695, %v754_v45  ;;  %1230 = vmatpush3.bf16.xpose.msra.mxu1 %v2407_v50  ;;  %vm2524_vm4 = vmpackc.low %vm724_vm2, %vm723_vm6  ;;  %vm2947_vm0 = vcmp.eq.s32.totalorder %v2431_v54, %v2155_v23 }
 0x20a   : > { %v2433_v57 = vpop.eup %1440  ;;  %1452 = vpow2.f32 %v783_v49  ;;  %1231 = vmatprep.subr.bf16.mxu1 %v1752_v20  ;;  %vm725_vm13 = vmand %vm2447_vm8, %vm2498_vm1  ;;  %v2560_v49 = vadd.s32 88, %v2151_v22 }
 0x20b   : > { %v1443_v58 = vpop.eup %1442  ;;  %1454 = vpow2.f32 %v779_v53  ;;  %v2442_v60 = vpop.f32.mrb[12].mxu0  ;;  %vm2550_vm2 = vmand %vm639_vm11, %vm2953_vm5 }
 0x20c   : > { %v2451_v63 = vpop.eup %1444  ;;  %v759_v0 = vsub.f32 %v2442_v60, %v2189_v33  ;;  %v2455_v1 = vpop.f32.mrb[13].mxu0  ;;  %vm695_vm15 = vmand %vm2174_vm3, %vm2947_vm0  ;;  %v626_v10 = vadd.s32 %v2160_v24, %v2560_v49  ;;  %vm2952_vm1 = vcmp.eq.s32.totalorder %v2560_v49, %v2155_v23 }
 0x20d   : > { %v1447_v5 = vpop.eup %1446  ;;  %v757_v6 = vsub.f32 %v2455_v1, %v2189_v33  ;;  %v2471_v7 = vpop.f32.mrb[14].mxu0  ;;  %v796_v8 = vpack.c.bf16 %v2451_v63, %v2433_v57  ;;  %vm696_vm11 = vmand %vm2174_vm3, %vm2948_vm14 }
 0x20e   : > { %v789_v11 = vmul.f32 1.442695, %v759_v0  ;;  %v760_v13 = vsub.f32 %v2471_v7, %v2189_v33  ;;  %v2484_v15 = vpop.f32.mrb[15].mxu0  ;;  %v795_v17 = vpack.c.bf16 %v1447_v5, %v1443_v58  ;;  %v625_v58 = vadd.s32 %v2160_v24, %v2538_v12  ;;  %vm2582_vm0 = vmxor %vm695_vm15, %vm2949_vm12 }
 0x20f   : > { %v785_v21 = vmul.f32 1.442695, %v757_v6  ;;  %v758_v25 = vsub.f32 %v2484_v15, %v2189_v33  ;;  %v624_v33 = vadd.s32 %v2160_v24, %v2467_v4  ;;  %vm2588_vm14 = vmxor %vm696_vm11, %vm2949_vm12  ;;  %vm2951_vm12 = vcmp.eq.s32.totalorder %v2538_v12, %v2155_v23 }
 0x210   : > { %1456 = vpow2.f32 %v789_v11  ;;  %v791_v36 = vmul.f32 1.442695, %v760_v13  ;;  %v2579_v3 = vsel %vm2524_vm4, %v795_v17, 0  ;;  %vm3031_vm4 = vmand %vm2489_vm7, %vm2507_vm10  ;;  %vm641_vm15 = vcmp.lt.s32.totalorder %v625_v58, 12 }
 0x211   : > { %1458 = vpow2.f32 %v785_v21  ;;  %v787_v44 = vmul.f32 1.442695, %v758_v25  ;;  %1232 = vmatpush3.bf16.xpose.msra.mxu1 %v2504_v38  ;;  %vm640_vm6 = vcmp.lt.s32.totalorder %v624_v33, 12  ;;  %vm727_vm11 = vmand %vm2550_vm2, %vm2582_vm0  ;;  %vm642_vm8 = vcmp.lt.s32.totalorder %v626_v10, 12 }
 0x212   : > { %v2528_v45 = vpop.eup %1448  ;;  %1460 = vpow2.f32 %v791_v36  ;;  %1233 = vmatprep.subr.bf16.mxu1 %v1752_v20  ;;  %vm2573_vm9 = vmand %vm640_vm6, %vm2953_vm5  ;;  %v2642_v36 = vadd.s32 104, %v2151_v22  ;;  %v627_v33 = vadd.s32 %v2160_v24, %v2618_v61  ;;  %v1755_v5 = vmov 1065369472  }
 0x213   : > { %v1451_v34 = vpop.eup %1450  ;;  %1462 = vpow2.f32 %v787_v44  ;;  %vm2607_vm6 = vmpackc.low %vm3031_vm4, %vm725_vm13 }
 0x214   : > { %v2546_v42 = vpop.eup %1452  ;;  %vm2630_vm10 = vmand %vm641_vm15, %vm2953_vm5  ;;  %v2656_v44 = vsel %vm2607_vm6, %v796_v8, 0  ;;  %v628_v63 = vadd.s32 %v2160_v24, %v2642_v36  ;;  %vm2956_vm2 = vcmp.eq.s32.totalorder %v2642_v36, %v2155_v23 }
 0x215   : > { %v1455_v47 = vpop.eup %1454  ;;  %v798_v52 = vpack.c.bf16 %v2546_v42, %v2528_v45  ;;  %vm697_vm13 = vmand %vm2174_vm3, %vm2951_vm12  ;;  %vm3038_vm12 = vmmov 1  }
 0x216   : > { %v797_v53 = vpack.c.bf16 %v1455_v47, %v1451_v34  ;;  %vm698_vm4 = vmand %vm2174_vm3, %vm2952_vm1  ;;  %v2712_v34 = vadd.s32 112, %v2151_v22  ;;  %v2728_v47 = vadd.s32 120, %v2151_v22 }
 0x217   : > { %vm2660_vm15 = vmand %vm642_vm8, %vm2953_vm5  ;;  %vm2955_vm5 = vcmp.eq.s32.totalorder %v2618_v61, %v2155_v23 }
 0x218   : > { %vm2666_vm1 = vmxor %vm697_vm13, %vm3038_vm12  ;;  %vm643_vm13 = vcmp.lt.s32.totalorder %v627_v33, 12  ;;  %v630_v58 = vadd.s32 %v2160_v24, %v2728_v47 }
 0x219   : > { %1234 = vmatpush3.bf16.xpose.msra.mxu1 %v2579_v3  ;;  %vm2672_vm7 = vmxor %vm698_vm4, %vm3038_vm12  ;;  %vm644_vm12 = vcmp.lt.s32.totalorder %v628_v63, 12 }
 0x21a   : > { %v2594_v11 = vpop.eup %1456  ;;  %1235 = vmatprep.subr.bf16.mxu1 %v1752_v20  ;;  %vm3043_vm6 = vmand %vm2573_vm9, %vm2588_vm14  ;;  %vm3044_vm9 = vcmp.lt.s32.totalorder %v2168_v28, 12 }
 0x21b   : > { %v1459_v17 = vpop.eup %1458  ;;  %vm805_vm8 = vmpackc.low %vm3043_vm6, %vm727_vm11 }
 0x21c   : > { %v2620_v18 = vpop.eup %1460  ;;  %vm729_vm4 = vmand %vm2630_vm10, %vm2666_vm1  ;;  %v813_v42 = vsel %vm805_vm8, %v797_v53, 0  ;;  %v629_v53 = vadd.s32 %v2160_v24, %v2712_v34  ;;  %vm682_vm1 = vcmp.eq.s32.totalorder %v2712_v34, %v2155_v23 }
 0x21d   : > { %v1463_v21 = vpop.eup %1462  ;;  %v800_v27 = vpack.c.bf16 %v2620_v18, %v2594_v11  ;;  %vm2702_vm14 = vmand %vm643_vm13, %vm3044_vm9 }
 0x21e   : > { %v799_v41 = vpack.c.bf16 %v1463_v21, %v1459_v17  ;;  %vm699_vm11 = vmand %vm2174_vm3, %vm2955_vm5  ;;  %vm3050_vm5 = vmmov 1   ;;  %v1756_v17 = vmov (!%p667_p7), 0.0  }
 0x21f   : > { %vm700_vm6 = vmand %vm2174_vm3, %vm2956_vm2  ;;  %vm645_vm2 = vcmp.lt.s32.totalorder %v629_v53, 12  ;;  %1249 = vmatprep.subr.bf16.mxu0 (!%p667_p7), %v1756_v17 }
 0x220   : > { %vm3047_vm13 = vmmov %vm3044_vm9  ;;  %1250 = vmatpush3.bf16.msra.mxu0 (!%p667_p7), %v2407_v50 }
 0x221   : > { %1236 = vmatpush3.bf16.xpose.msra.mxu1 %v2656_v44  ;;  %vm2721_vm9 = vmand %vm644_vm12, %vm3047_vm13  ;;  %1251 = vmatprep.subr.bf16.mxu0 (!%p667_p7), %v1756_v17 }
 0x222   : > { %1237 = vmatprep.subr.bf16.mxu1 %v1752_v20  ;;  %vm715_vm0 = vmxor %vm699_vm11, %vm3050_vm5 }
 0x223   : > { %vm716_vm8 = vmxor %vm700_vm6, %vm3050_vm5 }
 0x224   : > { %vm3051_vm12 = vmand %vm2660_vm15, %vm2672_vm7  ;;  %vm683_vm7 = vcmp.eq.s32.totalorder %v2728_v47, %v2155_v23  ;;  %vm646_vm15 = vcmp.lt.s32.totalorder %v630_v58, 12  ;;  %1252 = vmatpush3.bf16.msra.mxu0 (!%p667_p7), %v2504_v38 }
 0x225   : > { %vm806_vm13 = vmpackc.low %vm3051_vm12, %vm729_vm4  ;;  %vm3052_vm4 = vcmp.lt.s32.totalorder %v2168_v28, 12  ;;  %1253 = vmatprep.subr.bf16.mxu0 (!%p667_p7), %v1756_v17 }
 0x226   : > { %vm731_vm11 = vmand %vm2702_vm14, %vm715_vm0  ;;  %v814_v0 = vsel %vm806_vm13, %v798_v52, 0 }
 0x227   : > { %vm732_vm6 = vmand %vm2721_vm9, %vm716_vm8 }
 0x228   : > { %vm807_vm10 = vmpackc.low %vm732_vm6, %vm731_vm11  ;;  %1254 = vmatpush3.bf16.msra.mxu0 (!%p667_p7), %v2579_v3 }
 0x229   : > { %1238 = vmatpush3.bf16.xpose.msra.mxu1 %v813_v42  ;;  %vm665_vm0 = vmand %vm645_vm2, %vm3052_vm4  ;;  %v815_v24 = vsel %vm807_vm10, %v799_v41, 0  ;;  %1255 = vmatprep.subr.bf16.mxu0 (!%p667_p7), %v1756_v17 }
 0x22a   : > { %1239 = vmatprep.subr.bf16.mxu1 %v1752_v20  ;;  %vm701_vm14 = vmand %vm2174_vm3, %vm682_vm1 }
 0x22b   : > { %vm702_vm9 = vmand %vm2174_vm3, %vm683_vm7  ;;  %vm1757_vm3 = vmmov (!%p667_p7), 0  }
 0x22c   : > { %vm3053_vm8 = vmmov %vm3052_vm4  ;;  %1265 = vmatprep.mubr.msk.bf16.mxu0 (!%p667_p7), %vm1757_vm3, %v1756_v17  ;;  %1256 = vmatpush3.bf16.msra.mxu0 (!%p667_p7), %v2656_v44 }
 0x22d   : > { %vm666_vm12 = vmand %vm646_vm15, %vm3053_vm8  ;;  %1257 = vmatprep.subr.bf16.mxu0 (!%p667_p7), %v1756_v17 }
 0x22e   : > { %vm717_vm13 = vmxor %vm701_vm14, %vm3050_vm5 }
 0x22f   : > { %vm718_vm2 = vmxor %vm702_vm9, %vm3050_vm5 }
 0x230   : > { %vm733_vm11 = vmand %vm665_vm0, %vm717_vm13  ;;  %1258 = vmatpush3.bf16.msra.mxu0 (!%p667_p7), %v813_v42 }
 0x231   : > { %1240 = vmatpush3.bf16.xpose.msra.mxu1 %v814_v0  ;;  %vm734_vm6 = vmand %vm666_vm12, %vm718_vm2  ;;  %1259 = vmatprep.subr.bf16.mxu0 (!%p667_p7), %v1756_v17 }
 0x232   : > { %1241 = vmatprep.subr.bf16.mxu1 %v1752_v20  ;;  %vm808_vm4 = vmpackc.low %vm734_vm6, %vm733_vm11 }
 0x233   : > { %v816_v52 = vsel %vm808_vm4, %v800_v27, 0 }
 0x234   : > { %1260 = vmatpush3.bf16.msra.mxu0 (!%p667_p7), %v814_v0 }
 0x235   : > { %1261 = vmatprep.subr.bf16.mxu0 (!%p667_p7), %v1756_v17 }
 0x238   : > { %1262 = vmatpush3.bf16.msra.mxu0 (!%p667_p7), %v815_v24 }
 0x239   : > { %1242 = vmatpush3.bf16.xpose.msra.mxu1 %v815_v24  ;;  %1263 = vmatprep.subr.bf16.mxu0 (!%p667_p7), %v1756_v17 }
 0x23a   : > { %1243 = vmatprep.subr.bf16.mxu1 %v1752_v20  ;;  %v1758_v20 = vmov (!%p667_p7), 1065369472  }
 0x23c   : > { %1264 = vmatpush3.bf16.msra.mxu0 (!%p667_p7), %v816_v52 }
 0x23f   : > { %1266 = vmatmul.mubr.bf16.vlgmr.msra.gmra.mrb[0].mxu0 (!%p667_p7), %v1758_v20 }
 0x241   : > { %1244 = vmatpush3.bf16.xpose.msra.mxu1 %v816_v52 }
 0x248   : > { %1246 = vmatmul.mubr.bf16.vlgmr.msra.gmra.mrb[0].mxu1 %v1755_v5 }
 0x312   : > { %v899_v18 = vpop.f32.mrb[0].mxu0 (!%p667_p7) }
 0x313   : > { %v1267_v21 = vpop.f32.mrb[1].mxu0 (!%p667_p7) }
 0x314   : > { %v902_v25 = vpop.f32.mrb[2].mxu0 (!%p667_p7) }
 0x315   : > { %v1268_v3 = vpop.f32.mrb[3].mxu0 (!%p667_p7) }
 0x318   : > { %864 = sbr.rel (%p667_p7) target bundleno = 809 (0x329), region = 48 }
 0x31b   : > { %v851_v6 = vpop.f32.mrb[0].mxu1 }
 0x31c   : > { %v859_v28 = vadd.f32 %v858_v31, %v851_v6  ;;  %v1247_v10 = vpop.f32.mrb[1].mxu1 }
 0x31d   : > { %v854_v11 = vpop.f32.mrb[2].mxu1 }
 0x31e   : > { %860 = vst [vmem:[%s857_s5] sm:$0x1] %v859_v28  ;;  %v1248_v13 = vpop.f32.mrb[3].mxu1 }
 0x325   : > { %v906_v50 = vld [vmem:[%s905_s10] sm:$0x1] }
 0x326   : > { %v907_v38 = vadd.f32 %v906_v50, %v899_v18 }
 0x328   : > { %908 = vst [vmem:[%s905_s10] sm:$0x1] %v907_v38 }
 0x329 PF: > { %s3054_s25 = sld [smem:[#allocation31_spill]] }
 0x32f   : > { %s909_s11 = sld [smem:[#allocation11 + %s3054_s25]] }
 0x335   : > { %p1157_p10 = scmp.ne.s32.totalorder %s909_s11, 1 }
 0x336   : > { %vm3055_vm5 = vcmp.eq.s32.totalorder (!%p1157_p10), %v2151_v22, %v2155_v23  ;;  %vm3056_vm10 = vcmp.eq.s32.totalorder (!%p1157_p10), %v2163_v26, %v2155_v23  ;;  %vm3057_vm15 = vcmp.eq.s32.totalorder (!%p1157_p10), %v2180_v32, %v2155_v23  ;;  %vm3058_vm0 = vcmp.eq.s32.totalorder (!%p1157_p10), %v2198_v35, %v2155_v23  ;;  %v930_v34 = vld [vmem:[#allocation3] sm:$0x1] (!%p1157_p10) }
 0x337   : > { %913 = sbr.rel (%p1157_p10) target bundleno = 1064 (0x428), region = 52  ;;  %v914_v27 = vsel (!%p1157_p10), %vm3055_vm5, %v2217_v40, 0.0  ;;  %v915_v41 = vsel (!%p1157_p10), %vm3056_vm10, %v2237_v48, 0.0  ;;  %v916_v33 = vsel (!%p1157_p10), %vm3057_vm15, %v2207_v37, 0.0  ;;  %v917_v30 = vsel (!%p1157_p10), %vm3058_vm0, %v2226_v43, 0.0 }
 0x338   : > { %v931_v44 = vadd.f32 (!%p1157_p10), %v915_v41, %v914_v27  ;;  %vm3059_vm14 = vcmp.eq.s32.totalorder (!%p1157_p10), %v2248_v51, %v2155_v23  ;;  %vm3060_vm9 = vcmp.eq.s32.totalorder (!%p1157_p10), %v2268_v55, %v2155_v23  ;;  %vm3061_vm8 = vcmp.eq.s32.totalorder (!%p1157_p10), %v2332_v9, %v2155_v23 }
 0x339   : > { %v918_v40 = vsel (!%p1157_p10), %vm3059_vm14, %v2281_v59, 0.0  ;;  %v919_v26 = vsel (!%p1157_p10), %vm3060_vm9, %v2300_v2, 0.0  ;;  %v920_v37 = vsel (!%p1157_p10), %vm3061_vm8, %v2270_v56, 0.0  ;;  %vm3062_vm12 = vcmp.eq.s32.totalorder (!%p1157_p10), %v2360_v16, %v2155_v23 }
 0x33a   : > { %v932_v45 = vadd.f32 (!%p1157_p10), %v931_v44, %v916_v33  ;;  %v921_v43 = vsel (!%p1157_p10), %vm3062_vm12, %v2291_v62, 0.0  ;;  %vm3063_vm13 = vcmp.eq.s32.totalorder (!%p1157_p10), %v2431_v54, %v2155_v23  ;;  %vm3064_vm2 = vcmp.eq.s32.totalorder (!%p1157_p10), %v2467_v4, %v2155_v23 }
 0x33b   : > { %v922_v51 = vsel (!%p1157_p10), %vm3063_vm13, %v2364_v19, 0.0  ;;  %v923_v59 = vsel (!%p1157_p10), %vm3064_vm2, %v2387_v39, 0.0  ;;  %vm3065_vm11 = vcmp.eq.s32.totalorder (!%p1157_p10), %v2538_v12, %v2155_v23  ;;  %vm3066_vm6 = vcmp.eq.s32.totalorder (!%p1157_p10), %v2560_v49, %v2155_v23 }
 0x33c   : > { %v933_v57 = vadd.f32 (!%p1157_p10), %v932_v45, %v917_v30  ;;  %v924_v56 = vsel (!%p1157_p10), %vm3065_vm11, %v2348_v14, 0.0  ;;  %v925_v62 = vsel (!%p1157_p10), %vm3066_vm6, %v2375_v29, 0.0  ;;  %vm3067_vm4 = vcmp.eq.s32.totalorder (!%p1157_p10), %v2618_v61, %v2155_v23 }
 0x33d   : > { %v926_v19 = vsel (!%p1157_p10), %vm3067_vm4, %v2455_v1, 0.0  ;;  %vm3068_vm3 = vcmp.eq.s32.totalorder (!%p1157_p10), %v2642_v36, %v2155_v23  ;;  %v928_v14 = vsel (!%p1157_p10), %vm682_vm1, %v2442_v60, 0.0  ;;  %v929_v29 = vsel (!%p1157_p10), %vm683_vm7, %v2471_v7, 0.0 }
 0x33e   : > { %v934_v32 = vadd.f32 %v933_v57, %v918_v40  ;;  %v927_v39 = vsel %vm3068_vm3, %v2484_v15, 0.0  ;;  %vm958_vm1 = vcmask 0  }
 0x340   : > { %v935_v35 = vadd.f32 %v934_v32, %v919_v26 }
 0x342   : > { %v936_v48 = vadd.f32 %v935_v35, %v920_v37 }
 0x344   : > { %v937_v55 = vadd.f32 %v936_v48, %v921_v43 }
 0x346   : > { %v938_v2 = vadd.f32 %v937_v55, %v922_v51 }
 0x348   : > { %v939_v9 = vadd.f32 %v938_v2, %v923_v59 }
 0x34a   : > { %v940_v16 = vadd.f32 %v939_v9, %v924_v56 }
 0x34c   : > { %v941_v54 = vadd.f32 %v940_v16, %v925_v62 }
 0x34e   : > { %v942_v4 = vadd.f32 %v941_v54, %v926_v19 }
 0x350   : > { %v943_v12 = vadd.f32 %v942_v4, %v927_v39 }
 0x352   : > { %v944_v49 = vadd.f32 %v943_v12, %v928_v14 }
 0x354   : > { %v945_v1 = vadd.f32 %v944_v49, %v929_v29 }
 0x356   : > { %946 = vadd.xlane.f32.xlu0 %v945_v1 }
 0x3e3   : > { %v947_v61 = vpop.xlane.xlu0 %946 }
 0x3e4   : > { %v948_v63 = vrot.slane %v947_v61, 4 }
 0x3e6   : > { %v949_v8 = vadd.f32 %v948_v63, %v947_v61 }
 0x3e8   : > { %v950_v36 = vrot.slane %v949_v8, 2 }
 0x3ea   : > { %v951_v15 = vadd.f32 %v950_v36, %v949_v8 }
 0x3ec   : > { %v952_v42 = vrot.slane %v951_v15, 1 }
 0x3ee   : > { %v953_v46 = vadd.f32 %v952_v42, %v951_v15 }
 0x3f0   : > { %1269 = vpush %v953_v46 }
 0x421   : > { %s1270_s0 = spop %1269 }
 0x422   : > { %s955_s30 = smul.f32 2.0, %s1270_s0 }
 0x424   : > { %v956_v60 = vstv %s955_s30 }
 0x425   : > { %v957_v53 = vadd.f32 %v956_v60, %v930_v34 }
 0x427   : > { %959 = vst.msk [vmem:[#allocation3] sm:$0x1] %vm958_vm1, %v957_v53 }
 0x428 PF: > { %s3069_s20 = sld [smem:[#allocation31_spill]] }
 0x42e   : > { %p1158_p11 = scmp.ne.s32.totalorder %s3069_s20, 2 }
 0x42f   : > { %v964_v7 = vld [vmem:[#allocation12] sm:$0x1] (!%p1158_p11)  ;;  %s2846_s19 = smov (!%p1158_p11), 0.0   ;;  %s2848_s21 = smov (!%p1158_p11), 0  }
 0x430   : > { %963 = sbr.rel (%p1158_p11) target bundleno = 1425 (0x591), region = 56 }
 0x437 LB: >> { %v1759_v47 = vmov 0   ;;  %vm972_vm7 = vcmp.lt.s32.totalorder %v2155_v23, 12  ;;  %s973_s18 = scalar_lea.vmem [#allocation2], %s1737_s21  ;;  %v985_v52 = vsub.s32 0, %v2151_v22  ;;  %vm989_vm5 = vcmask 1040384   ;;  %s970_s21 = sadd.s32 1, %s1737_s21   ;;  %s1737_s21 = sphi %s2848_s21, %s970_s21   ;;  %s1733_s19 = sphi %s2846_s19, %s3070_s19  }
 0x438   : >> { %1464 = vset.pattern.permute.xlu0 %v1759_v47  ;;  %v974_v58 = vld [vmem:[%s973_s18] sm:$0x1]  ;;  %p967_p4 = scmp.ge.s32.totalorder %s970_s21, 2  }
 0x439   : >> { %980 = vperm.xlu0 %1464, %v964_v7   ;;  %v975_v0 = vsel %vm972_vm7, %v974_v58, 1.0  ;;  %v1001_v25 = vld [vmem:[#allocation3] sm:$0x1] (%p967_p4)  ;;  %vm1004_vm10 = vcmask (%p967_p4), 0  }
 0x43a   : >> { %1465 = vlog2.f32 %v975_v0 }
 0x444   : >> { %v1466_v24 = vpop.eup %1465 }
 0x445   : >> { %v977_v5 = vmul.f32 0.6931472, %v1466_v24 }
 0x4b8   : >> { %v981_v31 = vpop.permute.xlu0 %980 }
 0x4b9   : >> { %v986_v6 = vrot.slane %v981_v31, %v985_v52 }
 0x4bb   : >> { %v987_v28 = vadd.f32 %v986_v6, %v977_v5 }
 0x4bd   : >> { %v988_v10 = vsel %vm972_vm7, %v987_v28, 0.0 }
 0x4be   : >> { %v990_v11 = vsel %vm989_vm5, %v988_v10, 0.0 }
 0x4bf   : >> { %991 = vadd.xlane.f32.xlu0 %v990_v11 }
 0x54c   : >> { %v992_v13 = vpop.xlane.xlu0 %991 }
 0x54d   : >> { %v993_v17 = vrot.slane %v992_v13, 4 }
 0x54f   : >> { %v994_v20 = vadd.f32 %v993_v17, %v992_v13 }
 0x551   : >> { %v995_v50 = vrot.slane %v994_v20, 2 }
 0x553   : >> { %v996_v18 = vadd.f32 %v995_v50, %v994_v20 }
 0x555   : >> { %v997_v38 = vrot.slane %v996_v18, 1 }
 0x557   : >> { %v998_v21 = vadd.f32 %v997_v38, %v996_v18 }
 0x559   : >> { %1271 = vpush %v998_v21 }
 0x587   : > { %969 = sbr.rel (!%p967_p4) target bundleno = 1079 (0x437), region = 109 }
 0x58a   : >> { %s1272_s2 = spop %1271 }
 0x58b   : >> { %s1000_s28 = sadd.f32 %s1733_s19, %s1272_s2  }
 0x58d   : >> { %s3070_s19 = smov %s1000_s28  ;;  %v1002_v3 = vstv (%p967_p4), %s1000_s28 }
 0x58e   : > { %v1003_v27 = vsub.f32 %v1002_v3, %v1001_v25 }
 0x590   : > { %1005 = vst.msk [vmem:[#allocation18] sm:$0x1] %vm1004_vm10, %v1003_v27 }
 0x591 PF: > { %s3071_s17 = sadd.s32 4294967295, %s1729_s27   ;;  %s1760_s3 = smov [#allocation18]  }
 0x592   : > { %p2867_p6 = scmp.eq.s32.totalorder %s3071_s17, 2  ;;  %s1015_s22 = sshll.u32 %s1760_s3, 4  ;;  %s1016_s22 = int_to_ptr.vmem [resolvable:$true] %s1015_s22 }
 0x593   : > { %s1611_s16 = scalar_lea.vmem %s1016_s22, 16  ;;  %s1617_s13 = scalar_lea.vmem %s1016_s22, 32 }
 0x594   : > { %p1612_p8 = scmp.ne.s32.totalorder %s1016_s22, %s1611_s16  ;;  %p1618_p0 = scmp.lt.s32.totalorder %s1016_s22, %s1016_s22 }
 0x595   : > { %p1619_p5 = scmp.lt.s32.totalorder %s1617_s13, %s1611_s16 }
 0x596   : > { %p1613_p1 = pnand %p1612_p8, %p2867_p6 }
 0x597   : > { %p1620_p2 = por %p1619_p5, %p1618_p0 }
 0x598   : > { %p1614_p9 = pneg %p1613_p1 }
 0x59a   : > { %p1621_p3 = pnand %p1620_p2, %p1614_p9 }
 0x59c   : > { %1624 = shalt.err (!%p1621_p3)
}
 0x59d   : > { %s3073_s4 = sld [smem:[#allocation33_spill]] }
 0x5a3   : > { %s1625_s5 = scalar_lea.hbm %s3073_s4, 16 }
 0x5a4   : > { %p1626_p13 = scmp.ne.s32.totalorder %s3073_s4, %s1625_s5  ;;  %p1631_p10 = scmp.lt.u32.totalorder %s1625_s5, %s3073_s4 }
 0x5a6   : > { %p1627_p12 = pnand %p1626_p13, %p2867_p6 }
 0x5a8   : > { %p1628_p7 = pneg %p1627_p12 }
 0x5aa   : > { %p1633_p11 = pnand %p1631_p10, %p1628_p7 }
 0x5ac   : > { %1636 = shalt.err (!%p1633_p11)
}
 0x5ad   : > { %1286 = dma.vmem_to_hbm [thread:$0]  (%p2867_p6), %s1016_s22, 16, %s3073_s4, [#allocation15]  }
 0x5ae   : > { %1692 = dma.done.wait (%p2867_p6), [#allocation15], 16  }
 0x5af   : > { %1694 = vsyncadd (%p2867_p6), [#allocation15], 4294967280 }
 0x5b0 PF: > { %s59_s27 = sadd.s32 1, %s1729_s27   ;;  %s3074_s19 = sld [smem:[#allocation32_spill]] }
 0x5b1   : > { %p56_p4 = scmp.ge.s32.totalorder %s59_s27, 5   ;;  %s3075_s0 = smov %s1701_s6 }
 0x5b2   : > { %s3076_s6 = smov %s1705_s1  ;;  %s3077_s1 = smov %s2038_s14 }
 0x5b3   : > { %s3078_s9 = smov %s1713_s23  ;;  %s3079_s23 = smov %s1717_s24 }
 0x5b4   : > { %s3081_s25 = smov %s1725_s26  ;;  %s3082_s26 = smov %s3084_s29 }
 0x5b5   :  { %58 = sbr.rel (!%p56_p4) target bundleno = 87 (0x57), region = 120 }
 0x5b6   : > { %s3080_s24 = smov %s3074_s19 }
 0x5bc   :  { %1028 = vsyncpa [#allocation14], 1 }
 0x5bd   :  { %1030 = vsyncpa [#allocation14 + $0x1], 1 }
 0x5be   :  { %1031 = vsyncpa [#allocation17], 1 }
 0x5bf   :  { %1033 = vsyncpa [#allocation17 + $0x1], 1 }
 0x5c0   :  { %1034 = vsyncpa [#allocation15], 1 }
 0x5c1   :  { %1036 = vsyncpa [#allocation15 + $0x1], 1 }

</bundles_post_ra>
